<compile_context>
chip_gen: v6e
topology: v6e:2x2x1
jax: 0.10.0
libtpu: 0.0.40
codegen_flags: <defaults>
</compile_context>

<pallas_src>
import functools

import jax
import jax.numpy as jnp
import numpy as np
from jax import lax
from jax.experimental import pallas as pl
from jax.experimental.pallas import tpu as pltpu


def _round_up(x, m):
    return (x + m - 1) // m * m


def _fused_gru_kernel(T, Bt, P, TC,
                      x_hbm, wih_ref, whh_ref, bih_ref, bhh_ref,
                      rout_ref, hn_ref, gi_ref, dma_sem):
    """All GRU layers for one batch tile; grid=(batch_tiles, num_layers)."""
    b = pl.program_id(0)
    l = pl.program_id(1)

    # Layer 0: one-time DMA of this batch tile's padded input, HBM -> the
    # VMEM-resident r_out block.  x never occupies a pipelined VMEM block.
    @pl.when(l == 0)
    def _():
        cp = pltpu.make_async_copy(x_hbm.at[b], rout_ref, dma_sem)
        cp.start()
        cp.wait()

    mx_dtype = wih_ref.dtype  # matmul operand dtype (bf16 by default)

    # Loop-invariant values hoisted once (JAX does not CSE broadcast_in_dim).
    wih = wih_ref[...]                                     # (P, 3P)
    whh = whh_ref[...]                                     # (P, 3P)
    bih = bih_ref[...]                                     # (1, 3P)  f32
    bhh = jnp.broadcast_to(bhh_ref[...], (Bt, 3 * P))      # (Bt, 3P) f32

    def run_chunk(t0, steps, h):
        # Hoisted input-side gates for `steps` timesteps at once:
        #   (steps*Bt, P) @ (P, 3P) + b_ih  -> chunked gi scratch.
        seq = rout_ref[pl.ds(t0, steps)].reshape(steps * Bt, P).astype(mx_dtype)
        gi = jnp.dot(seq, wih, preferred_element_type=jnp.float32) + bih
        gi_ref[pl.ds(0, steps)] = gi.reshape(steps, Bt, 3 * P)

        def step(i, h):
            gi_t = gi_ref[i]                               # (Bt, 3P), f32
            gh = jnp.dot(h.astype(mx_dtype), whh,
                         preferred_element_type=jnp.float32) + bhh
            # PyTorch gate order: reset, update, new.  Each gate chunk is a
            # 128-lane-aligned slice (offsets 0, P, 2P).
            i_r, i_z, i_n = gi_t[:, 0:P], gi_t[:, P:2 * P], gi_t[:, 2 * P:3 * P]
            h_r, h_z, h_n = gh[:, 0:P], gh[:, P:2 * P], gh[:, 2 * P:3 * P]
            r = jax.nn.sigmoid(i_r + h_r)
            z = jax.nn.sigmoid(i_z + h_z)
            n = jnp.tanh(i_n + r * h_n)
            h_new = n + z * (h - n)                        # == (1-z)*n + z*h
            rout_ref[t0 + i] = h_new                       # lane-dense store
            return h_new

        return lax.fori_loop(0, steps, step, h, unroll=min(steps, 8))

    h = jnp.zeros((Bt, P), jnp.float32)
    n_full, rem = T // TC, T % TC
    if n_full > 0:
        def chunk_body(c, h):
            return run_chunk(pl.multiple_of(c * TC, TC), TC, h)
        h = lax.fori_loop(0, n_full, chunk_body, h)
    if rem > 0:
        h = run_chunk(n_full * TC, rem, h)
    hn_ref[...] = h


def pack_gru_params(params, hidden_size, P, matmul_dtype):
    """Pack PyTorch-layout GRU params into padded, lane-aligned stacks.

    params: per layer (w_ih (3H,in), w_hh (3H,H), b_ih (3H,), b_hh (3H,)).
    Each gate occupies its own 128-lane-aligned chunk of width P.
    Returns (w_ih (L,P,3P), w_hh (L,P,3P), b_ih (L,1,3P), b_hh (L,1,3P)).
    """
    L, H = len(params), hidden_size
    wih_all = np.zeros((L, P, 3 * P), np.float32)
    whh_all = np.zeros((L, P, 3 * P), np.float32)
    bih_all = np.zeros((L, 1, 3 * P), np.float32)
    bhh_all = np.zeros((L, 1, 3 * P), np.float32)
    for layer, (w_ih, w_hh, b_ih, b_hh) in enumerate(params):
        in_dim = w_ih.shape[1]
        w_ih_t = np.asarray(w_ih).T    # (in, 3H)
        w_hh_t = np.asarray(w_hh).T    # (H, 3H)
        b_ih = np.asarray(b_ih)
        b_hh = np.asarray(b_hh)
        for g in range(3):
            wih_all[layer, :in_dim, g * P:g * P + H] = w_ih_t[:, g * H:(g + 1) * H]
            whh_all[layer, :H,      g * P:g * P + H] = w_hh_t[:, g * H:(g + 1) * H]
            bih_all[layer, 0,       g * P:g * P + H] = b_ih[g * H:(g + 1) * H]
            bhh_all[layer, 0,       g * P:g * P + H] = b_hh[g * H:(g + 1) * H]
    return (jnp.asarray(wih_all, matmul_dtype),
            jnp.asarray(whh_all, matmul_dtype),
            jnp.asarray(bih_all, jnp.float32),
            jnp.asarray(bhh_all, jnp.float32))


def encoder_rnn_forward(x, params, hidden_size, *, matmul_dtype=jnp.bfloat16,
                        time_chunk=32):
    """Equivalent of Encoder_RNN.forward: returns (r_out, h_n)."""
    T, B, I = x.shape
    H, L = hidden_size, len(params)
    P = _round_up(max(I, H), 128)   # shared lane-padded width (input & hidden)
    Bp0 = _round_up(B, 8)
    nb = 2 if Bp0 >= 16 else 1      # batch tiles ("parallel" -> 2nd core on v7x)
    Bp = _round_up(B, 8 * nb)       # sublane-padded batch
    Bt = Bp // nb                   # rows per batch tile
    TC = min(T, time_chunk)         # gi scratch covers only TC timesteps

    wih, whh, bih, bhh = pack_gru_params(params, H, P, matmul_dtype)

    x_pad = jnp.zeros((T, Bp, P), jnp.float32).at[:, :B, :I].set(
        x.astype(jnp.float32))
    # (nb, T, Bt, P): contiguous per batch tile so the layer-0 DMA is one
    # dense copy per tile.
    x_tiles = x_pad.reshape(T, nb, Bt, P).transpose(1, 0, 2, 3)

    # Explicit VMEM budget (defaults are 16 MiB on v5e, 32 MiB on v6e/v7x).
    wbytes = jnp.dtype(matmul_dtype).itemsize
    bytes_needed = (
        2 * T * Bt * P * 4                 # r_out block (double-buffered)
        + TC * Bt * 3 * P * 4              # chunked gi scratch
        + 2 * 2 * P * 3 * P * wbytes       # W_ih + W_hh (double-buffered)
        + 4 * Bt * P * 4                   # h_n block + bias slack
    )
    vmem_limit = int(min(max(2 * bytes_needed, 32 * 2**20), 112 * 2**20))

    kernel = functools.partial(_fused_gru_kernel, T, Bt, P, TC)
    r_out_pad, h_n_pad = pl.pallas_call(
        kernel,
        out_shape=(jax.ShapeDtypeStruct((T, Bp, P), jnp.float32),
                   jax.ShapeDtypeStruct((L, Bp, P), jnp.float32)),
        grid_spec=pltpu.PrefetchScalarGridSpec(
            num_scalar_prefetch=0,
            grid=(nb, L),
            in_specs=[
                pl.BlockSpec(memory_space=pl.ANY),                       # x (HBM)
                pl.BlockSpec((None, P, 3 * P), lambda b, l: (l, 0, 0)),  # W_ih[l]
                pl.BlockSpec((None, P, 3 * P), lambda b, l: (l, 0, 0)),  # W_hh[l]
                pl.BlockSpec((None, 1, 3 * P), lambda b, l: (l, 0, 0)),  # b_ih[l]
                pl.BlockSpec((None, 1, 3 * P), lambda b, l: (l, 0, 0)),  # b_hh[l]
            ],
            out_specs=[
                # r_out doubles as the inter-layer sequence buffer: constant
                # layer index -> VMEM-resident across layers of a batch tile.
                pl.BlockSpec((T, Bt, P), lambda b, l: (0, b, 0)),
                pl.BlockSpec((None, Bt, P), lambda b, l: (l, b, 0)),
            ],
            scratch_shapes=[
                pltpu.VMEM((TC, Bt, 3 * P), jnp.float32),   # chunked gi
                pltpu.SemaphoreType.DMA(()),                # layer-0 x DMA
            ],
        ),
        compiler_params=pltpu.CompilerParams(
            dimension_semantics=("parallel", "arbitrary"),
            vmem_limit_bytes=vmem_limit),
    )(x_tiles, wih, whh, bih, bhh)

    return r_out_pad[:, :B, :H], h_n_pad[:, :B, :H]


def init_gru_params(key, input_size, hidden_size, num_layers):
    """PyTorch-shaped GRU params: per layer (W_ih (3H,in), W_hh (3H,H), b_ih, b_hh)."""
    params = []
    k = 1.0 / np.sqrt(hidden_size)
    for layer in range(num_layers):
        in_dim = input_size if layer == 0 else hidden_size
        key, k1, k2, k3, k4 = jax.random.split(key, 5)
        w_ih = jax.random.uniform(k1, (3 * hidden_size, in_dim), jnp.float32, -k, k)
        w_hh = jax.random.uniform(k2, (3 * hidden_size, hidden_size), jnp.float32, -k, k)
        b_ih = jax.random.uniform(k3, (3 * hidden_size,), jnp.float32, -k, k)
        b_hh = jax.random.uniform(k4, (3 * hidden_size,), jnp.float32, -k, k)
        params.append((w_ih, w_hh, b_ih, b_hh))
    return params


def _gru_reference(x, params, matmul_dtype):
    """Pure-JAX reference with the same bf16-in / f32-accumulate math."""
    T, B, _ = x.shape
    inp = x.astype(jnp.float32)
    h_last = []
    for (w_ih, w_hh, b_ih, b_hh) in params:
        H = w_hh.shape[1]
        wih_t = w_ih.T.astype(matmul_dtype)
        whh_t = w_hh.T.astype(matmul_dtype)
        h = jnp.zeros((B, H), jnp.float32)
        outs = []
        for t in range(T):
            gi = jnp.dot(inp[t].astype(matmul_dtype), wih_t,
                         preferred_element_type=jnp.float32) + b_ih
            gh = jnp.dot(h.astype(matmul_dtype), whh_t,
                         preferred_element_type=jnp.float32) + b_hh
            r = jax.nn.sigmoid(gi[:, :H] + gh[:, :H])
            z = jax.nn.sigmoid(gi[:, H:2 * H] + gh[:, H:2 * H])
            n = jnp.tanh(gi[:, 2 * H:] + r * gh[:, 2 * H:])
            h = (1.0 - z) * n + z * h
            outs.append(h)
        inp = jnp.stack(outs, axis=0)
        h_last.append(h)
    return inp, jnp.stack(h_last, axis=0)


def _run_and_check(seq_len, batch, input_size, hidden_size, num_layers, seed,
                   time_chunk):
    key = jax.random.PRNGKey(seed)
    key, kx = jax.random.split(key)
    x = jax.random.normal(kx, (seq_len, batch, input_size), jnp.float32)
    params = init_gru_params(key, input_size, hidden_size, num_layers)

    r_out, h_n = encoder_rnn_forward(x, params, hidden_size,
                                     time_chunk=time_chunk)
    r_out = jax.block_until_ready(r_out)
    h_n = jax.block_until_ready(h_n)

    assert r_out.shape == (seq_len, batch, hidden_size)
    assert h_n.shape == (num_layers, batch, hidden_size)

    r_ref, h_ref = _gru_reference(x, params, jnp.bfloat16)
    np.testing.assert_allclose(np.asarray(r_out), np.asarray(r_ref),
                               rtol=1e-4, atol=1e-4)
    np.testing.assert_allclose(np.asarray(h_n), np.asarray(h_ref),
                               rtol=1e-4, atol=1e-4)


if __name__ == "__main__":
    # Base config: seq=8, batch=2, input=16, hidden=32, 2 layers.
    _run_and_check(seq_len=8, batch=2, input_size=16, hidden_size=32,
                   num_layers=2, seed=0, time_chunk=32)
    # Exercise time-chunking (full chunks + remainder) and the parallel
    # batch-tile grid axis (2 tiles) at still-small shapes.
    _run_and_check(seq_len=11, batch=10, input_size=16, hidden_size=32,
                   num_layers=2, seed=0, time_chunk=4)

    print("KERNEL_OK")
</pallas_src>

<mosaic_0001>
module attributes {stable_mosaic.version = 11 : i64} {
  func.func @_fused_gru_kernel(%arg0: i32, %arg1: i32, %arg2: memref<1x8x8x128xf32, #tpu.memory_space<any>>, %arg3: memref<1x128x384xbf16, #tpu.memory_space<vmem>>, %arg4: memref<1x128x384xbf16, #tpu.memory_space<vmem>>, %arg5: memref<1x1x384xf32, #tpu.memory_space<vmem>>, %arg6: memref<1x1x384xf32, #tpu.memory_space<vmem>>, %arg7: memref<8x8x128xf32, #tpu.memory_space<vmem>>, %arg8: memref<1x8x128xf32, #tpu.memory_space<vmem>>, %arg9: memref<8x8x384xf32, #tpu.memory_space<vmem>>, %arg10: memref<!tpu.dma_semaphore, #tpu.memory_space<semaphore_mem>>) attributes {dimension_semantics = [#tpu.dimension_semantics<parallel>, #tpu.dimension_semantics<arbitrary>], iteration_bounds = array<i64: 1, 2>, scalar_prefetch = 0 : i64, scratch_operands = 2 : i64, tpu.core_type = #tpu.core_type<tc>, window_params = [{}, {transform_indices = @transform_1, window_bounds = array<i64: 1, 128, 384>}, {transform_indices = @transform_2, window_bounds = array<i64: 1, 128, 384>}, {transform_indices = @transform_3, window_bounds = array<i64: 1, 1, 384>}, {transform_indices = @transform_4, window_bounds = array<i64: 1, 1, 384>}, {transform_indices = @transform_5, window_bounds = array<i64: 8, 8, 128>}, {transform_indices = @transform_6, window_bounds = array<i64: 1, 8, 128>}]} {
    %c0_i32 = arith.constant 0 : i32
    %0 = arith.cmpi eq, %arg1, %c0_i32 : i32
    %1 = arith.extui %0 : i1 to i32
    %c0_i32_0 = arith.constant 0 : i32
    %2 = arith.cmpi ne, %1, %c0_i32_0 : i32
    scf.if %2 {
      %c0_i32_81 = arith.constant 0 : i32
      %c0_i32_82 = arith.constant 0 : i32
      %c0_i32_83 = arith.constant 0 : i32
      %308 = tpu.memref_slice %arg2[%arg0, %c0_i32_81, %c0_i32_82, %c0_i32_83] : memref<1x8x8x128xf32, #tpu.memory_space<any>> -> memref<1x8x8x128xf32, #tpu.memory_space<any>>
      %309 = tpu.memref_squeeze %308 : memref<1x8x8x128xf32, #tpu.memory_space<any>> -> memref<8x8x128xf32, #tpu.memory_space<any>>
      tpu.enqueue_dma source(%309 : memref<8x8x128xf32, #tpu.memory_space<any>>) target(%arg7 : memref<8x8x128xf32, #tpu.memory_space<vmem>>) target_semaphore(%arg10 : memref<!tpu.dma_semaphore, #tpu.memory_space<semaphore_mem>>)
      %c0_i32_84 = arith.constant 0 : i32
      %c0_i32_85 = arith.constant 0 : i32
      %c0_i32_86 = arith.constant 0 : i32
      %310 = tpu.memref_slice %arg2[%arg0, %c0_i32_84, %c0_i32_85, %c0_i32_86] : memref<1x8x8x128xf32, #tpu.memory_space<any>> -> memref<1x8x8x128xf32, #tpu.memory_space<any>>
      %311 = tpu.memref_squeeze %310 : memref<1x8x8x128xf32, #tpu.memory_space<any>> -> memref<8x8x128xf32, #tpu.memory_space<any>>
      tpu.wait_dma2 semaphore(%arg10 : memref<!tpu.dma_semaphore, #tpu.memory_space<semaphore_mem>>) src(%311 : memref<8x8x128xf32, #tpu.memory_space<any>>) dst(%arg7 : memref<8x8x128xf32, #tpu.memory_space<vmem>>)
    } else {
    }
    %c0 = arith.constant 0 : index
    %c0_1 = arith.constant 0 : index
    %c0_2 = arith.constant 0 : index
    %3 = vector.load %arg3[%c0, %c0_1, %c0_2] : memref<1x128x384xbf16, #tpu.memory_space<vmem>>, vector<1x128x384xbf16>
    %4 = vector.shape_cast %3 : vector<1x128x384xbf16> to vector<128x384xbf16>
    %c0_3 = arith.constant 0 : index
    %c0_4 = arith.constant 0 : index
    %c0_5 = arith.constant 0 : index
    %5 = vector.load %arg4[%c0_3, %c0_4, %c0_5] : memref<1x128x384xbf16, #tpu.memory_space<vmem>>, vector<1x128x384xbf16>
    %6 = vector.shape_cast %5 : vector<1x128x384xbf16> to vector<128x384xbf16>
    %c0_6 = arith.constant 0 : index
    %c0_7 = arith.constant 0 : index
    %c0_8 = arith.constant 0 : index
    %7 = vector.load %arg5[%c0_6, %c0_7, %c0_8] : memref<1x1x384xf32, #tpu.memory_space<vmem>>, vector<1x1x384xf32>
    %8 = vector.shape_cast %7 : vector<1x1x384xf32> to vector<1x384xf32>
    %c0_9 = arith.constant 0 : index
    %c0_10 = arith.constant 0 : index
    %c0_11 = arith.constant 0 : index
    %9 = vector.load %arg6[%c0_9, %c0_10, %c0_11] : memref<1x1x384xf32, #tpu.memory_space<vmem>>, vector<1x1x384xf32>
    %10 = vector.shape_cast %9 : vector<1x1x384xf32> to vector<1x384xf32>
    %11 = vector.shape_cast %10 : vector<1x384xf32> to vector<1x384xf32>
    %12 = vector.broadcast %11 : vector<1x384xf32> to vector<8x384xf32>
    %cst = arith.constant 0.000000e+00 : f32
    %13 = vector.broadcast %cst : f32 to vector<8x128xf32>
    %c0_i32_12 = arith.constant 0 : i32
    %c8_i32 = arith.constant 8 : i32
    %14 = arith.muli %c0_i32_12, %c8_i32 : i32
    %15 = tpu.assume_multiple %14, 8 : i32
    %16 = arith.index_cast %15 : i32 to index
    %c0_13 = arith.constant 0 : index
    %c0_14 = arith.constant 0 : index
    %17 = vector.load %arg7[%16, %c0_13, %c0_14] : memref<8x8x128xf32, #tpu.memory_space<vmem>>, vector<8x8x128xf32>
    %18 = vector.shape_cast %17 : vector<8x8x128xf32> to vector<64x128xf32>
    %19 = arith.truncf %18 : vector<64x128xf32> to vector<64x128xbf16>
    %cst_15 = arith.constant dense<0.000000e+00> : vector<64x384xf32>
    %20 = tpu.matmul %19, %4, %cst_15 {dimension_numbers = #tpu.dot_dimension_numbers<[1], [0], [0], [1], [0, 0, 1, 1], [], []>} : vector<64x128xbf16>, vector<128x384xbf16>, vector<64x384xf32> -> vector<64x384xf32>
    %21 = vector.broadcast %8 : vector<1x384xf32> to vector<64x384xf32>
    %22 = arith.addf %20, %21 : vector<64x384xf32>
    %23 = vector.shape_cast %22 : vector<64x384xf32> to vector<8x8x384xf32>
    %c0_16 = arith.constant 0 : index
    %c0_17 = arith.constant 0 : index
    %c0_18 = arith.constant 0 : index
    %24 = vector.load %arg9[%c0_16, %c0_17, %c0_18] : memref<8x8x384xf32, #tpu.memory_space<vmem>>, vector<8x8x384xf32>
    tpu.vector_store %arg9[%c0_16, %c0_17, %c0_18], %23 {strides = array<i32>} : memref<8x8x384xf32, #tpu.memory_space<vmem>>, vector<8x8x384xf32>,
    %c0_i32_19 = arith.constant 0 : i32
    %25 = arith.index_cast %c0_i32_19 : i32 to index
    %c0_20 = arith.constant 0 : index
    %c0_21 = arith.constant 0 : index
    %26 = vector.load %arg9[%25, %c0_20, %c0_21] : memref<8x8x384xf32, #tpu.memory_space<vmem>>, vector<1x8x384xf32>
    %27 = vector.shape_cast %26 : vector<1x8x384xf32> to vector<8x384xf32>
    %28 = arith.truncf %13 : vector<8x128xf32> to vector<8x128xbf16>
    %cst_22 = arith.constant dense<0.000000e+00> : vector<8x384xf32>
    %29 = tpu.matmul %28, %6, %cst_22 {dimension_numbers = #tpu.dot_dimension_numbers<[1], [0], [0], [1], [0, 0, 1, 1], [], []>} : vector<8x128xbf16>, vector<128x384xbf16>, vector<8x384xf32> -> vector<8x384xf32>
    %30 = arith.addf %29, %12 : vector<8x384xf32>
    %31 = vector.extract_strided_slice %27 {offsets = [0, 0], sizes = [8, 128], strides = [1, 1]} : vector<8x384xf32> to vector<8x128xf32>
    %32 = vector.extract_strided_slice %27 {offsets = [0, 128], sizes = [8, 128], strides = [1, 1]} : vector<8x384xf32> to vector<8x128xf32>
    %33 = vector.extract_strided_slice %27 {offsets = [0, 256], sizes = [8, 128], strides = [1, 1]} : vector<8x384xf32> to vector<8x128xf32>
    %34 = vector.extract_strided_slice %30 {offsets = [0, 0], sizes = [8, 128], strides = [1, 1]} : vector<8x384xf32> to vector<8x128xf32>
    %35 = vector.extract_strided_slice %30 {offsets = [0, 128], sizes = [8, 128], strides = [1, 1]} : vector<8x384xf32> to vector<8x128xf32>
    %36 = vector.extract_strided_slice %30 {offsets = [0, 256], sizes = [8, 128], strides = [1, 1]} : vector<8x384xf32> to vector<8x128xf32>
    %37 = arith.addf %31, %34 : vector<8x128xf32>
    %38 = arith.negf %37 : vector<8x128xf32>
    %39 = math.exp %38 : vector<8x128xf32>
    %cst_23 = arith.constant 1.000000e+00 : f32
    %40 = vector.broadcast %cst_23 : f32 to vector<8x128xf32>
    %41 = arith.addf %40, %39 : vector<8x128xf32>
    %42 = arith.divf %40, %41 : vector<8x128xf32>
    %43 = arith.addf %32, %35 : vector<8x128xf32>
    %44 = arith.negf %43 : vector<8x128xf32>
    %45 = math.exp %44 : vector<8x128xf32>
    %cst_24 = arith.constant 1.000000e+00 : f32
    %46 = vector.broadcast %cst_24 : f32 to vector<8x128xf32>
    %47 = arith.addf %46, %45 : vector<8x128xf32>
    %48 = arith.divf %46, %47 : vector<8x128xf32>
    %49 = arith.mulf %42, %36 : vector<8x128xf32>
    %50 = arith.addf %33, %49 : vector<8x128xf32>
    %51 = math.tanh %50 : vector<8x128xf32>
    %52 = arith.subf %13, %51 : vector<8x128xf32>
    %53 = arith.mulf %48, %52 : vector<8x128xf32>
    %54 = arith.addf %51, %53 : vector<8x128xf32>
    %55 = arith.addi %15, %c0_i32_19 : i32
    %56 = arith.index_cast %55 : i32 to index
    %c0_25 = arith.constant 0 : index
    %c0_26 = arith.constant 0 : index
    %57 = vector.load %arg7[%56, %c0_25, %c0_26] : memref<8x8x128xf32, #tpu.memory_space<vmem>>, vector<1x8x128xf32>
    %58 = vector.shape_cast %57 : vector<1x8x128xf32> to vector<8x128xf32>
    %59 = vector.shape_cast %54 : vector<8x128xf32> to vector<1x8x128xf32>
    tpu.vector_store %arg7[%56, %c0_25, %c0_26], %59 {strides = array<i32>} : memref<8x8x128xf32, #tpu.memory_space<vmem>>, vector<1x8x128xf32>,
    %c1_i32 = arith.constant 1 : i32
    %60 = arith.index_cast %c1_i32 : i32 to index
    %c0_27 = arith.constant 0 : index
    %c0_28 = arith.constant 0 : index
    %61 = vector.load %arg9[%60, %c0_27, %c0_28] : memref<8x8x384xf32, #tpu.memory_space<vmem>>, vector<1x8x384xf32>
    %62 = vector.shape_cast %61 : vector<1x8x384xf32> to vector<8x384xf32>
    %63 = arith.truncf %54 : vector<8x128xf32> to vector<8x128xbf16>
    %cst_29 = arith.constant dense<0.000000e+00> : vector<8x384xf32>
    %64 = tpu.matmul %63, %6, %cst_29 {dimension_numbers = #tpu.dot_dimension_numbers<[1], [0], [0], [1], [0, 0, 1, 1], [], []>} : vector<8x128xbf16>, vector<128x384xbf16>, vector<8x384xf32> -> vector<8x384xf32>
    %65 = arith.addf %64, %12 : vector<8x384xf32>
    %66 = vector.extract_strided_slice %62 {offsets = [0, 0], sizes = [8, 128], strides = [1, 1]} : vector<8x384xf32> to vector<8x128xf32>
    %67 = vector.extract_strided_slice %62 {offsets = [0, 128], sizes = [8, 128], strides = [1, 1]} : vector<8x384xf32> to vector<8x128xf32>
    %68 = vector.extract_strided_slice %62 {offsets = [0, 256], sizes = [8, 128], strides = [1, 1]} : vector<8x384xf32> to vector<8x128xf32>
    %69 = vector.extract_strided_slice %65 {offsets = [0, 0], sizes = [8, 128], strides = [1, 1]} : vector<8x384xf32> to vector<8x128xf32>
    %70 = vector.extract_strided_slice %65 {offsets = [0, 128], sizes = [8, 128], strides = [1, 1]} : vector<8x384xf32> to vector<8x128xf32>
    %71 = vector.extract_strided_slice %65 {offsets = [0, 256], sizes = [8, 128], strides = [1, 1]} : vector<8x384xf32> to vector<8x128xf32>
    %72 = arith.addf %66, %69 : vector<8x128xf32>
    %73 = arith.negf %72 : vector<8x128xf32>
    %74 = math.exp %73 : vector<8x128xf32>
    %cst_30 = arith.constant 1.000000e+00 : f32
    %75 = vector.broadcast %cst_30 : f32 to vector<8x128xf32>
    %76 = arith.addf %75, %74 : vector<8x128xf32>
    %77 = arith.divf %75, %76 : vector<8x128xf32>
    %78 = arith.addf %67, %70 : vector<8x128xf32>
    %79 = arith.negf %78 : vector<8x128xf32>
    %80 = math.exp %79 : vector<8x128xf32>
    %cst_31 = arith.constant 1.000000e+00 : f32
    %81 = vector.broadcast %cst_31 : f32 to vector<8x128xf32>
    %82 = arith.addf %81, %80 : vector<8x128xf32>
    %83 = arith.divf %81, %82 : vector<8x128xf32>
    %84 = arith.mulf %77, %71 : vector<8x128xf32>
    %85 = arith.addf %68, %84 : vector<8x128xf32>
    %86 = math.tanh %85 : vector<8x128xf32>
    %87 = arith.subf %54, %86 : vector<8x128xf32>
    %88 = arith.mulf %83, %87 : vector<8x128xf32>
    %89 = arith.addf %86, %88 : vector<8x128xf32>
    %90 = arith.addi %15, %c1_i32 : i32
    %91 = arith.index_cast %90 : i32 to index
    %c0_32 = arith.constant 0 : index
    %c0_33 = arith.constant 0 : index
    %92 = vector.load %arg7[%91, %c0_32, %c0_33] : memref<8x8x128xf32, #tpu.memory_space<vmem>>, vector<1x8x128xf32>
    %93 = vector.shape_cast %92 : vector<1x8x128xf32> to vector<8x128xf32>
    %94 = vector.shape_cast %89 : vector<8x128xf32> to vector<1x8x128xf32>
    tpu.vector_store %arg7[%91, %c0_32, %c0_33], %94 {strides = array<i32>} : memref<8x8x128xf32, #tpu.memory_space<vmem>>, vector<1x8x128xf32>,
    %c2_i32 = arith.constant 2 : i32
    %95 = arith.index_cast %c2_i32 : i32 to index
    %c0_34 = arith.constant 0 : index
    %c0_35 = arith.constant 0 : index
    %96 = vector.load %arg9[%95, %c0_34, %c0_35] : memref<8x8x384xf32, #tpu.memory_space<vmem>>, vector<1x8x384xf32>
    %97 = vector.shape_cast %96 : vector<1x8x384xf32> to vector<8x384xf32>
    %98 = arith.truncf %89 : vector<8x128xf32> to vector<8x128xbf16>
    %cst_36 = arith.constant dense<0.000000e+00> : vector<8x384xf32>
    %99 = tpu.matmul %98, %6, %cst_36 {dimension_numbers = #tpu.dot_dimension_numbers<[1], [0], [0], [1], [0, 0, 1, 1], [], []>} : vector<8x128xbf16>, vector<128x384xbf16>, vector<8x384xf32> -> vector<8x384xf32>
    %100 = arith.addf %99, %12 : vector<8x384xf32>
    %101 = vector.extract_strided_slice %97 {offsets = [0, 0], sizes = [8, 128], strides = [1, 1]} : vector<8x384xf32> to vector<8x128xf32>
    %102 = vector.extract_strided_slice %97 {offsets = [0, 128], sizes = [8, 128], strides = [1, 1]} : vector<8x384xf32> to vector<8x128xf32>
    %103 = vector.extract_strided_slice %97 {offsets = [0, 256], sizes = [8, 128], strides = [1, 1]} : vector<8x384xf32> to vector<8x128xf32>
    %104 = vector.extract_strided_slice %100 {offsets = [0, 0], sizes = [8, 128], strides = [1, 1]} : vector<8x384xf32> to vector<8x128xf32>
    %105 = vector.extract_strided_slice %100 {offsets = [0, 128], sizes = [8, 128], strides = [1, 1]} : vector<8x384xf32> to vector<8x128xf32>
    %106 = vector.extract_strided_slice %100 {offsets = [0, 256], sizes = [8, 128], strides = [1, 1]} : vector<8x384xf32> to vector<8x128xf32>
    %107 = arith.addf %101, %104 : vector<8x128xf32>
    %108 = arith.negf %107 : vector<8x128xf32>
    %109 = math.exp %108 : vector<8x128xf32>
    %cst_37 = arith.constant 1.000000e+00 : f32
    %110 = vector.broadcast %cst_37 : f32 to vector<8x128xf32>
    %111 = arith.addf %110, %109 : vector<8x128xf32>
    %112 = arith.divf %110, %111 : vector<8x128xf32>
    %113 = arith.addf %102, %105 : vector<8x128xf32>
    %114 = arith.negf %113 : vector<8x128xf32>
    %115 = math.exp %114 : vector<8x128xf32>
    %cst_38 = arith.constant 1.000000e+00 : f32
    %116 = vector.broadcast %cst_38 : f32 to vector<8x128xf32>
    %117 = arith.addf %116, %115 : vector<8x128xf32>
    %118 = arith.divf %116, %117 : vector<8x128xf32>
    %119 = arith.mulf %112, %106 : vector<8x128xf32>
    %120 = arith.addf %103, %119 : vector<8x128xf32>
    %121 = math.tanh %120 : vector<8x128xf32>
    %122 = arith.subf %89, %121 : vector<8x128xf32>
    %123 = arith.mulf %118, %122 : vector<8x128xf32>
    %124 = arith.addf %121, %123 : vector<8x128xf32>
    %125 = arith.addi %15, %c2_i32 : i32
    %126 = arith.index_cast %125 : i32 to index
    %c0_39 = arith.constant 0 : index
    %c0_40 = arith.constant 0 : index
    %127 = vector.load %arg7[%126, %c0_39, %c0_40] : memref<8x8x128xf32, #tpu.memory_space<vmem>>, vector<1x8x128xf32>
    %128 = vector.shape_cast %127 : vector<1x8x128xf32> to vector<8x128xf32>
    %129 = vector.shape_cast %124 : vector<8x128xf32> to vector<1x8x128xf32>
    tpu.vector_store %arg7[%126, %c0_39, %c0_40], %129 {strides = array<i32>} : memref<8x8x128xf32, #tpu.memory_space<vmem>>, vector<1x8x128xf32>,
    %c3_i32 = arith.constant 3 : i32
    %130 = arith.index_cast %c3_i32 : i32 to index
    %c0_41 = arith.constant 0 : index
    %c0_42 = arith.constant 0 : index
    %131 = vector.load %arg9[%130, %c0_41, %c0_42] : memref<8x8x384xf32, #tpu.memory_space<vmem>>, vector<1x8x384xf32>
    %132 = vector.shape_cast %131 : vector<1x8x384xf32> to vector<8x384xf32>
    %133 = arith.truncf %124 : vector<8x128xf32> to vector<8x128xbf16>
    %cst_43 = arith.constant dense<0.000000e+00> : vector<8x384xf32>
    %134 = tpu.matmul %133, %6, %cst_43 {dimension_numbers = #tpu.dot_dimension_numbers<[1], [0], [0], [1], [0, 0, 1, 1], [], []>} : vector<8x128xbf16>, vector<128x384xbf16>, vector<8x384xf32> -> vector<8x384xf32>
    %135 = arith.addf %134, %12 : vector<8x384xf32>
    %136 = vector.extract_strided_slice %132 {offsets = [0, 0], sizes = [8, 128], strides = [1, 1]} : vector<8x384xf32> to vector<8x128xf32>
    %137 = vector.extract_strided_slice %132 {offsets = [0, 128], sizes = [8, 128], strides = [1, 1]} : vector<8x384xf32> to vector<8x128xf32>
    %138 = vector.extract_strided_slice %132 {offsets = [0, 256], sizes = [8, 128], strides = [1, 1]} : vector<8x384xf32> to vector<8x128xf32>
    %139 = vector.extract_strided_slice %135 {offsets = [0, 0], sizes = [8, 128], strides = [1, 1]} : vector<8x384xf32> to vector<8x128xf32>
    %140 = vector.extract_strided_slice %135 {offsets = [0, 128], sizes = [8, 128], strides = [1, 1]} : vector<8x384xf32> to vector<8x128xf32>
    %141 = vector.extract_strided_slice %135 {offsets = [0, 256], sizes = [8, 128], strides = [1, 1]} : vector<8x384xf32> to vector<8x128xf32>
    %142 = arith.addf %136, %139 : vector<8x128xf32>
    %143 = arith.negf %142 : vector<8x128xf32>
    %144 = math.exp %143 : vector<8x128xf32>
    %cst_44 = arith.constant 1.000000e+00 : f32
    %145 = vector.broadcast %cst_44 : f32 to vector<8x128xf32>
    %146 = arith.addf %145, %144 : vector<8x128xf32>
    %147 = arith.divf %145, %146 : vector<8x128xf32>
    %148 = arith.addf %137, %140 : vector<8x128xf32>
    %149 = arith.negf %148 : vector<8x128xf32>
    %150 = math.exp %149 : vector<8x128xf32>
    %cst_45 = arith.constant 1.000000e+00 : f32
    %151 = vector.broadcast %cst_45 : f32 to vector<8x128xf32>
    %152 = arith.addf %151, %150 : vector<8x128xf32>
    %153 = arith.divf %151, %152 : vector<8x128xf32>
    %154 = arith.mulf %147, %141 : vector<8x128xf32>
    %155 = arith.addf %138, %154 : vector<8x128xf32>
    %156 = math.tanh %155 : vector<8x128xf32>
    %157 = arith.subf %124, %156 : vector<8x128xf32>
    %158 = arith.mulf %153, %157 : vector<8x128xf32>
    %159 = arith.addf %156, %158 : vector<8x128xf32>
    %160 = arith.addi %15, %c3_i32 : i32
    %161 = arith.index_cast %160 : i32 to index
    %c0_46 = arith.constant 0 : index
    %c0_47 = arith.constant 0 : index
    %162 = vector.load %arg7[%161, %c0_46, %c0_47] : memref<8x8x128xf32, #tpu.memory_space<vmem>>, vector<1x8x128xf32>
    %163 = vector.shape_cast %162 : vector<1x8x128xf32> to vector<8x128xf32>
    %164 = vector.shape_cast %159 : vector<8x128xf32> to vector<1x8x128xf32>
    tpu.vector_store %arg7[%161, %c0_46, %c0_47], %164 {strides = array<i32>} : memref<8x8x128xf32, #tpu.memory_space<vmem>>, vector<1x8x128xf32>,
    %c4_i32 = arith.constant 4 : i32
    %165 = arith.index_cast %c4_i32 : i32 to index
    %c0_48 = arith.constant 0 : index
    %c0_49 = arith.constant 0 : index
    %166 = vector.load %arg9[%165, %c0_48, %c0_49] : memref<8x8x384xf32, #tpu.memory_space<vmem>>, vector<1x8x384xf32>
    %167 = vector.shape_cast %166 : vector<1x8x384xf32> to vector<8x384xf32>
    %168 = arith.truncf %159 : vector<8x128xf32> to vector<8x128xbf16>
    %cst_50 = arith.constant dense<0.000000e+00> : vector<8x384xf32>
    %169 = tpu.matmul %168, %6, %cst_50 {dimension_numbers = #tpu.dot_dimension_numbers<[1], [0], [0], [1], [0, 0, 1, 1], [], []>} : vector<8x128xbf16>, vector<128x384xbf16>, vector<8x384xf32> -> vector<8x384xf32>
    %170 = arith.addf %169, %12 : vector<8x384xf32>
    %171 = vector.extract_strided_slice %167 {offsets = [0, 0], sizes = [8, 128], strides = [1, 1]} : vector<8x384xf32> to vector<8x128xf32>
    %172 = vector.extract_strided_slice %167 {offsets = [0, 128], sizes = [8, 128], strides = [1, 1]} : vector<8x384xf32> to vector<8x128xf32>
    %173 = vector.extract_strided_slice %167 {offsets = [0, 256], sizes = [8, 128], strides = [1, 1]} : vector<8x384xf32> to vector<8x128xf32>
    %174 = vector.extract_strided_slice %170 {offsets = [0, 0], sizes = [8, 128], strides = [1, 1]} : vector<8x384xf32> to vector<8x128xf32>
    %175 = vector.extract_strided_slice %170 {offsets = [0, 128], sizes = [8, 128], strides = [1, 1]} : vector<8x384xf32> to vector<8x128xf32>
    %176 = vector.extract_strided_slice %170 {offsets = [0, 256], sizes = [8, 128], strides = [1, 1]} : vector<8x384xf32> to vector<8x128xf32>
    %177 = arith.addf %171, %174 : vector<8x128xf32>
    %178 = arith.negf %177 : vector<8x128xf32>
    %179 = math.exp %178 : vector<8x128xf32>
    %cst_51 = arith.constant 1.000000e+00 : f32
    %180 = vector.broadcast %cst_51 : f32 to vector<8x128xf32>
    %181 = arith.addf %180, %179 : vector<8x128xf32>
    %182 = arith.divf %180, %181 : vector<8x128xf32>
    %183 = arith.addf %172, %175 : vector<8x128xf32>
    %184 = arith.negf %183 : vector<8x128xf32>
    %185 = math.exp %184 : vector<8x128xf32>
    %cst_52 = arith.constant 1.000000e+00 : f32
    %186 = vector.broadcast %cst_52 : f32 to vector<8x128xf32>
    %187 = arith.addf %186, %185 : vector<8x128xf32>
    %188 = arith.divf %186, %187 : vector<8x128xf32>
    %189 = arith.mulf %182, %176 : vector<8x128xf32>
    %190 = arith.addf %173, %189 : vector<8x128xf32>
    %191 = math.tanh %190 : vector<8x128xf32>
    %192 = arith.subf %159, %191 : vector<8x128xf32>
    %193 = arith.mulf %188, %192 : vector<8x128xf32>
    %194 = arith.addf %191, %193 : vector<8x128xf32>
    %195 = arith.addi %15, %c4_i32 : i32
    %196 = arith.index_cast %195 : i32 to index
    %c0_53 = arith.constant 0 : index
    %c0_54 = arith.constant 0 : index
    %197 = vector.load %arg7[%196, %c0_53, %c0_54] : memref<8x8x128xf32, #tpu.memory_space<vmem>>, vector<1x8x128xf32>
    %198 = vector.shape_cast %197 : vector<1x8x128xf32> to vector<8x128xf32>
    %199 = vector.shape_cast %194 : vector<8x128xf32> to vector<1x8x128xf32>
    tpu.vector_store %arg7[%196, %c0_53, %c0_54], %199 {strides = array<i32>} : memref<8x8x128xf32, #tpu.memory_space<vmem>>, vector<1x8x128xf32>,
    %c5_i32 = arith.constant 5 : i32
    %200 = arith.index_cast %c5_i32 : i32 to index
    %c0_55 = arith.constant 0 : index
    %c0_56 = arith.constant 0 : index
    %201 = vector.load %arg9[%200, %c0_55, %c0_56] : memref<8x8x384xf32, #tpu.memory_space<vmem>>, vector<1x8x384xf32>
    %202 = vector.shape_cast %201 : vector<1x8x384xf32> to vector<8x384xf32>
    %203 = arith.truncf %194 : vector<8x128xf32> to vector<8x128xbf16>
    %cst_57 = arith.constant dense<0.000000e+00> : vector<8x384xf32>
    %204 = tpu.matmul %203, %6, %cst_57 {dimension_numbers = #tpu.dot_dimension_numbers<[1], [0], [0], [1], [0, 0, 1, 1], [], []>} : vector<8x128xbf16>, vector<128x384xbf16>, vector<8x384xf32> -> vector<8x384xf32>
    %205 = arith.addf %204, %12 : vector<8x384xf32>
    %206 = vector.extract_strided_slice %202 {offsets = [0, 0], sizes = [8, 128], strides = [1, 1]} : vector<8x384xf32> to vector<8x128xf32>
    %207 = vector.extract_strided_slice %202 {offsets = [0, 128], sizes = [8, 128], strides = [1, 1]} : vector<8x384xf32> to vector<8x128xf32>
    %208 = vector.extract_strided_slice %202 {offsets = [0, 256], sizes = [8, 128], strides = [1, 1]} : vector<8x384xf32> to vector<8x128xf32>
    %209 = vector.extract_strided_slice %205 {offsets = [0, 0], sizes = [8, 128], strides = [1, 1]} : vector<8x384xf32> to vector<8x128xf32>
    %210 = vector.extract_strided_slice %205 {offsets = [0, 128], sizes = [8, 128], strides = [1, 1]} : vector<8x384xf32> to vector<8x128xf32>
    %211 = vector.extract_strided_slice %205 {offsets = [0, 256], sizes = [8, 128], strides = [1, 1]} : vector<8x384xf32> to vector<8x128xf32>
    %212 = arith.addf %206, %209 : vector<8x128xf32>
    %213 = arith.negf %212 : vector<8x128xf32>
    %214 = math.exp %213 : vector<8x128xf32>
    %cst_58 = arith.constant 1.000000e+00 : f32
    %215 = vector.broadcast %cst_58 : f32 to vector<8x128xf32>
    %216 = arith.addf %215, %214 : vector<8x128xf32>
    %217 = arith.divf %215, %216 : vector<8x128xf32>
    %218 = arith.addf %207, %210 : vector<8x128xf32>
    %219 = arith.negf %218 : vector<8x128xf32>
    %220 = math.exp %219 : vector<8x128xf32>
    %cst_59 = arith.constant 1.000000e+00 : f32
    %221 = vector.broadcast %cst_59 : f32 to vector<8x128xf32>
    %222 = arith.addf %221, %220 : vector<8x128xf32>
    %223 = arith.divf %221, %222 : vector<8x128xf32>
    %224 = arith.mulf %217, %211 : vector<8x128xf32>
    %225 = arith.addf %208, %224 : vector<8x128xf32>
    %226 = math.tanh %225 : vector<8x128xf32>
    %227 = arith.subf %194, %226 : vector<8x128xf32>
    %228 = arith.mulf %223, %227 : vector<8x128xf32>
    %229 = arith.addf %226, %228 : vector<8x128xf32>
    %230 = arith.addi %15, %c5_i32 : i32
    %231 = arith.index_cast %230 : i32 to index
    %c0_60 = arith.constant 0 : index
    %c0_61 = arith.constant 0 : index
    %232 = vector.load %arg7[%231, %c0_60, %c0_61] : memref<8x8x128xf32, #tpu.memory_space<vmem>>, vector<1x8x128xf32>
    %233 = vector.shape_cast %232 : vector<1x8x128xf32> to vector<8x128xf32>
    %234 = vector.shape_cast %229 : vector<8x128xf32> to vector<1x8x128xf32>
    tpu.vector_store %arg7[%231, %c0_60, %c0_61], %234 {strides = array<i32>} : memref<8x8x128xf32, #tpu.memory_space<vmem>>, vector<1x8x128xf32>,
    %c6_i32 = arith.constant 6 : i32
    %235 = arith.index_cast %c6_i32 : i32 to index
    %c0_62 = arith.constant 0 : index
    %c0_63 = arith.constant 0 : index
    %236 = vector.load %arg9[%235, %c0_62, %c0_63] : memref<8x8x384xf32, #tpu.memory_space<vmem>>, vector<1x8x384xf32>
    %237 = vector.shape_cast %236 : vector<1x8x384xf32> to vector<8x384xf32>
    %238 = arith.truncf %229 : vector<8x128xf32> to vector<8x128xbf16>
    %cst_64 = arith.constant dense<0.000000e+00> : vector<8x384xf32>
    %239 = tpu.matmul %238, %6, %cst_64 {dimension_numbers = #tpu.dot_dimension_numbers<[1], [0], [0], [1], [0, 0, 1, 1], [], []>} : vector<8x128xbf16>, vector<128x384xbf16>, vector<8x384xf32> -> vector<8x384xf32>
    %240 = arith.addf %239, %12 : vector<8x384xf32>
    %241 = vector.extract_strided_slice %237 {offsets = [0, 0], sizes = [8, 128], strides = [1, 1]} : vector<8x384xf32> to vector<8x128xf32>
    %242 = vector.extract_strided_slice %237 {offsets = [0, 128], sizes = [8, 128], strides = [1, 1]} : vector<8x384xf32> to vector<8x128xf32>
    %243 = vector.extract_strided_slice %237 {offsets = [0, 256], sizes = [8, 128], strides = [1, 1]} : vector<8x384xf32> to vector<8x128xf32>
    %244 = vector.extract_strided_slice %240 {offsets = [0, 0], sizes = [8, 128], strides = [1, 1]} : vector<8x384xf32> to vector<8x128xf32>
    %245 = vector.extract_strided_slice %240 {offsets = [0, 128], sizes = [8, 128], strides = [1, 1]} : vector<8x384xf32> to vector<8x128xf32>
    %246 = vector.extract_strided_slice %240 {offsets = [0, 256], sizes = [8, 128], strides = [1, 1]} : vector<8x384xf32> to vector<8x128xf32>
    %247 = arith.addf %241, %244 : vector<8x128xf32>
    %248 = arith.negf %247 : vector<8x128xf32>
    %249 = math.exp %248 : vector<8x128xf32>
    %cst_65 = arith.constant 1.000000e+00 : f32
    %250 = vector.broadcast %cst_65 : f32 to vector<8x128xf32>
    %251 = arith.addf %250, %249 : vector<8x128xf32>
    %252 = arith.divf %250, %251 : vector<8x128xf32>
    %253 = arith.addf %242, %245 : vector<8x128xf32>
    %254 = arith.negf %253 : vector<8x128xf32>
    %255 = math.exp %254 : vector<8x128xf32>
    %cst_66 = arith.constant 1.000000e+00 : f32
    %256 = vector.broadcast %cst_66 : f32 to vector<8x128xf32>
    %257 = arith.addf %256, %255 : vector<8x128xf32>
    %258 = arith.divf %256, %257 : vector<8x128xf32>
    %259 = arith.mulf %252, %246 : vector<8x128xf32>
    %260 = arith.addf %243, %259 : vector<8x128xf32>
    %261 = math.tanh %260 : vector<8x128xf32>
    %262 = arith.subf %229, %261 : vector<8x128xf32>
    %263 = arith.mulf %258, %262 : vector<8x128xf32>
    %264 = arith.addf %261, %263 : vector<8x128xf32>
    %265 = arith.addi %15, %c6_i32 : i32
    %266 = arith.index_cast %265 : i32 to index
    %c0_67 = arith.constant 0 : index
    %c0_68 = arith.constant 0 : index
    %267 = vector.load %arg7[%266, %c0_67, %c0_68] : memref<8x8x128xf32, #tpu.memory_space<vmem>>, vector<1x8x128xf32>
    %268 = vector.shape_cast %267 : vector<1x8x128xf32> to vector<8x128xf32>
    %269 = vector.shape_cast %264 : vector<8x128xf32> to vector<1x8x128xf32>
    tpu.vector_store %arg7[%266, %c0_67, %c0_68], %269 {strides = array<i32>} : memref<8x8x128xf32, #tpu.memory_space<vmem>>, vector<1x8x128xf32>,
    %c7_i32 = arith.constant 7 : i32
    %270 = arith.index_cast %c7_i32 : i32 to index
    %c0_69 = arith.constant 0 : index
    %c0_70 = arith.constant 0 : index
    %271 = vector.load %arg9[%270, %c0_69, %c0_70] : memref<8x8x384xf32, #tpu.memory_space<vmem>>, vector<1x8x384xf32>
    %272 = vector.shape_cast %271 : vector<1x8x384xf32> to vector<8x384xf32>
    %273 = arith.truncf %264 : vector<8x128xf32> to vector<8x128xbf16>
    %cst_71 = arith.constant dense<0.000000e+00> : vector<8x384xf32>
    %274 = tpu.matmul %273, %6, %cst_71 {dimension_numbers = #tpu.dot_dimension_numbers<[1], [0], [0], [1], [0, 0, 1, 1], [], []>} : vector<8x128xbf16>, vector<128x384xbf16>, vector<8x384xf32> -> vector<8x384xf32>
    %275 = arith.addf %274, %12 : vector<8x384xf32>
    %276 = vector.extract_strided_slice %272 {offsets = [0, 0], sizes = [8, 128], strides = [1, 1]} : vector<8x384xf32> to vector<8x128xf32>
    %277 = vector.extract_strided_slice %272 {offsets = [0, 128], sizes = [8, 128], strides = [1, 1]} : vector<8x384xf32> to vector<8x128xf32>
    %278 = vector.extract_strided_slice %272 {offsets = [0, 256], sizes = [8, 128], strides = [1, 1]} : vector<8x384xf32> to vector<8x128xf32>
    %279 = vector.extract_strided_slice %275 {offsets = [0, 0], sizes = [8, 128], strides = [1, 1]} : vector<8x384xf32> to vector<8x128xf32>
    %280 = vector.extract_strided_slice %275 {offsets = [0, 128], sizes = [8, 128], strides = [1, 1]} : vector<8x384xf32> to vector<8x128xf32>
    %281 = vector.extract_strided_slice %275 {offsets = [0, 256], sizes = [8, 128], strides = [1, 1]} : vector<8x384xf32> to vector<8x128xf32>
    %282 = arith.addf %276, %279 : vector<8x128xf32>
    %283 = arith.negf %282 : vector<8x128xf32>
    %284 = math.exp %283 : vector<8x128xf32>
    %cst_72 = arith.constant 1.000000e+00 : f32
    %285 = vector.broadcast %cst_72 : f32 to vector<8x128xf32>
    %286 = arith.addf %285, %284 : vector<8x128xf32>
    %287 = arith.divf %285, %286 : vector<8x128xf32>
    %288 = arith.addf %277, %280 : vector<8x128xf32>
    %289 = arith.negf %288 : vector<8x128xf32>
    %290 = math.exp %289 : vector<8x128xf32>
    %cst_73 = arith.constant 1.000000e+00 : f32
    %291 = vector.broadcast %cst_73 : f32 to vector<8x128xf32>
    %292 = arith.addf %291, %290 : vector<8x128xf32>
    %293 = arith.divf %291, %292 : vector<8x128xf32>
    %294 = arith.mulf %287, %281 : vector<8x128xf32>
    %295 = arith.addf %278, %294 : vector<8x128xf32>
    %296 = math.tanh %295 : vector<8x128xf32>
    %297 = arith.subf %264, %296 : vector<8x128xf32>
    %298 = arith.mulf %293, %297 : vector<8x128xf32>
    %299 = arith.addf %296, %298 : vector<8x128xf32>
    %300 = arith.addi %15, %c7_i32 : i32
    %301 = arith.index_cast %300 : i32 to index
    %c0_74 = arith.constant 0 : index
    %c0_75 = arith.constant 0 : index
    %302 = vector.load %arg7[%301, %c0_74, %c0_75] : memref<8x8x128xf32, #tpu.memory_space<vmem>>, vector<1x8x128xf32>
    %303 = vector.shape_cast %302 : vector<1x8x128xf32> to vector<8x128xf32>
    %304 = vector.shape_cast %299 : vector<8x128xf32> to vector<1x8x128xf32>
    tpu.vector_store %arg7[%301, %c0_74, %c0_75], %304 {strides = array<i32>} : memref<8x8x128xf32, #tpu.memory_space<vmem>>, vector<1x8x128xf32>,
    %c8_i32_76 = arith.constant 8 : i32
    %c1_i32_77 = arith.constant 1 : i32
    %c0_78 = arith.constant 0 : index
    %c0_79 = arith.constant 0 : index
    %c0_80 = arith.constant 0 : index
    %305 = vector.load %arg8[%c0_78, %c0_79, %c0_80] : memref<1x8x128xf32, #tpu.memory_space<vmem>>, vector<1x8x128xf32>
    %306 = vector.shape_cast %305 : vector<1x8x128xf32> to vector<8x128xf32>
    %307 = vector.shape_cast %299 : vector<8x128xf32> to vector<1x8x128xf32>
    tpu.vector_store %arg8[%c0_78, %c0_79, %c0_80], %307 {strides = array<i32>} : memref<1x8x128xf32, #tpu.memory_space<vmem>>, vector<1x8x128xf32>,
    return
  }
  func.func @transform_1(%arg0: i32, %arg1: i32) -> (i32, i32, i32) {
    %c0_i32 = arith.constant 0 : i32
    %c0_i32_0 = arith.constant 0 : i32
    %c0_i32_1 = arith.constant 0 : i32
    return %arg1, %c0_i32, %c0_i32_0 : i32, i32, i32
  }
  func.func @transform_2(%arg0: i32, %arg1: i32) -> (i32, i32, i32) {
    %c0_i32 = arith.constant 0 : i32
    %c0_i32_0 = arith.constant 0 : i32
    %c0_i32_1 = arith.constant 0 : i32
    return %arg1, %c0_i32, %c0_i32_0 : i32, i32, i32
  }
  func.func @transform_3(%arg0: i32, %arg1: i32) -> (i32, i32, i32) {
    %c0_i32 = arith.constant 0 : i32
    %c0_i32_0 = arith.constant 0 : i32
    %c0_i32_1 = arith.constant 0 : i32
    return %arg1, %c0_i32, %c0_i32_0 : i32, i32, i32
  }
  func.func @transform_4(%arg0: i32, %arg1: i32) -> (i32, i32, i32) {
    %c0_i32 = arith.constant 0 : i32
    %c0_i32_0 = arith.constant 0 : i32
    %c0_i32_1 = arith.constant 0 : i32
    return %arg1, %c0_i32, %c0_i32_0 : i32, i32, i32
  }
  func.func @transform_5(%arg0: i32, %arg1: i32) -> (i32, i32, i32) {
    %c0_i32 = arith.constant 0 : i32
    %c0_i32_0 = arith.constant 0 : i32
    %c0_i32_1 = arith.constant 0 : i32
    return %c0_i32, %arg0, %c0_i32_0 : i32, i32, i32
  }
  func.func @transform_6(%arg0: i32, %arg1: i32) -> (i32, i32, i32) {
    %c0_i32 = arith.constant 0 : i32
    %c0_i32_0 = arith.constant 0 : i32
    return %arg1, %arg0, %c0_i32 : i32, i32, i32
  }
}

</mosaic_0001>

<bundles_post_ra>
// kernel: tpu_custom_call.1
= control target key start
LH: loop header
LB: loop body
LE: loop exit
PB: predicated region body
PF: predicated region fallthrough
CT: control target
= control target key end

     0   :  { %s3677_s0 = inlined_call_operand.hbm [shape: f32[1,8,8,128], index: 0, kind: input, shape index: {}]   ;;  %s3678_s1 = inlined_call_operand.hbm [shape: bf16[2,128,384], index: 1, kind: input, shape index: {}]   ;;  %s3679_s2 = inlined_call_operand.hbm [shape: bf16[2,128,384], index: 2, kind: input, shape index: {}]   ;;  %s3680_s3 = inlined_call_operand.hbm [shape: f32[2,1,384], index: 3, kind: input, shape index: {}]   ;;  %s3681_s4 = inlined_call_operand.vmem [shape: f32[2,1,384], index: 4, kind: input, shape index: {}]   ;;  %s3682_s5 = inlined_call_operand.hbm [shape: f32[8,8,128], index: 5, kind: output, shape index: {0}]   ;;  %s3683_s6 = inlined_call_operand.hbm [shape: f32[2,8,128], index: 6, kind: output, shape index: {1}]  }
   0x1   :  { %3696 = sst [smem:[#allocation36_spill]] %s3679_s2 }
   0x2   :  { %3697 = sst [smem:[#allocation37_spill]] %s3682_s5 }
   0x3   :  { %12 = vsyncpa [#allocation5], 0 }
   0x4   :  { %14 = vsyncpa [#allocation5 + $0x1], 0 }
   0x5   :  { %15 = vsyncpa [#allocation8], 0 }
   0x6   :  { %17 = vsyncpa [#allocation8 + $0x1], 0 }
   0x7   :  { %18 = vsyncpa [#allocation6], 0 }
   0x8   :  { %19 = vsyncpa [#allocation12], 0 }
   0x9   :  { %21 = vsyncpa [#allocation12 + $0x1], 0  ;;  %s2866_s21 = smov 0   ;;  %s2868_s22 = smov 0  }
   0xa   :  { %s2870_s23 = smov 0   ;;  %s2872_s24 = smov 0  }
   0xb   :  { %s2874_s25 = smov 0   ;;  %s2876_s26 = smov 0  }
   0xc LB: > { %3698 = sst [smem:[#allocation22_spill]] %s2797_s21  ;;  %s2897_s27 = sadd.s32 4294967295, %s2817_s26   ;;  %s2817_s26 = sphi %s2876_s26, %s27_s26   ;;  %s2813_s25 = sphi %s2874_s25, %s3746_s25   ;;  %s2809_s24 = sphi %s2872_s24, %s3745_s24   ;;  %s2805_s23 = sphi %s2870_s23, %s3741_s23   ;;  %s2801_s22 = sphi %s2868_s22, %s3744_s22   ;;  %s2797_s21 = sphi %s2866_s21, %s3743_s21  }
   0xd   : > { %3699 = sst [smem:[#allocation23_spill]] %s2805_s23  ;;  %s1978_s28 = sadd.s32 4294967294, %s2817_s26  }
   0xe   : > { %3700 = sst [smem:[#allocation24_spill]] %s2817_s26  ;;  %s36_s29 = sadd.s32 1, %s2813_s25 }
   0xf   : > { %s46_s30 = sadd.s32 1, %s2805_s23  ;;  %p37_p0 = scmp.ge.s32.totalorder %s36_s29, 2 }
  0x10   : > { %p53_p1 = scmp.ne.s32.totalorder %s2805_s23, %s2801_s22  ;;  %p54_p2 = scmp.eq.s32.totalorder %s2817_s26, 0 }
  0x11   : > { %p59_p3 = scmp.ne.s32.totalorder %s2801_s22, %s2797_s21  ;;  %s3748_s29 = smov (%p37_p0, %s36_s29), 0 }
  0x12   : > { %3701 = sst [smem:[#allocation25_spill]] %s3748_s29  ;;  %p2909_p4 = por %p54_p2, %p53_p1 }
  0x13   : > { %p60_p5 = scmp.eq.s32.totalorder %s2897_s27, 0  ;;  %s43_s8 = ssub.s32 %s2813_s25, %s3748_s29 }
  0x14   : > { %p3685_p6 = scmp.eq.s32.totalorder %s2897_s27, 1  ;;  %p44_p7 = scmp.eq.s32.totalorder %s43_s8, 0 }
  0x15   : > { %p2917_p8 = por %p60_p5, %p59_p3  ;;  %p195_p10 = scmp.eq.s32.totalorder %s1978_s28, 1 }
  0x16   : > { %p2923_p9 = por %p3685_p6, %p53_p1  ;;  %p2364_p13 = scmp.lt.s32.totalorder %s2817_s26, 2 }
  0x17   : > { %s2928_s11 = scalar_select %p44_p7, %s2805_s23, %s46_s30  }
  0x18   : > { %p2930_p11 = por %p195_p10, %p59_p3  ;;  %s2937_s13 = sand.u32 1, %s2805_s23  }
  0x19   : > { %3705 = sst [smem:[#allocation26_spill]] %s2928_s11  ;;  %s2326_s14 = smul.u32 192, %s2937_s13 }
  0x1a   : > { %s3706_s12 = scalar_select %p2930_p11, 1, 0 }
  0x1b   : > { %s2327_s15 = smul.u32 3072, %s2813_s25  ;;  %p2943_p0 = pnand %p2364_p13, %p2909_p4 }
  0x1c   : > { %3707 = sst [smem:[#allocation27_spill]] %s3706_s12  ;;  %s236_s17 = sand.u32 1, %s2817_s26  }
  0x1d   : > { %s3709_s2 = sld [smem:[#allocation36_spill]]  ;;  %s240_s28 = scalar_lea.vmem [#allocation7], %s2326_s14 }
  0x1e   : > { %s247_s30 = sshll.u32 %s240_s28, 4  ;;  %p1984_p1 = scmp.ge.s32.totalorder %s2817_s26, 1  ;;  %s248_s30 = int_to_ptr.vmem [resolvable:$true] %s247_s30 }
  0x1f   : > { %p281_p2 = scmp.lt.s32.totalorder %s2817_s26, 3  ;;  %s2957_s8 = scalar_lea.sflag [#allocation8], %s236_s17 }
  0x20   : > { %p2595_p3 = pneg %p2943_p0  ;;  %s2606_s7 = scalar_lea.vmem %s248_s30, 3072 }
  0x21   : > { %p2607_p4 = scmp.ne.s32.totalorder %s248_s30, %s2606_s7  ;;  %s2819_s29 = smov [#allocation7]  }
  0x22   : > { %s2611_s11 = sshll.u32 %s2819_s29, 4  ;;  %s2612_s11 = int_to_ptr.vmem [resolvable:$false] %s2611_s11 }
  0x23   : > { %s246_s20 = scalar_lea.hbm %s3709_s2, %s2327_s15  ;;  %p2609_p5 = pnand %p2607_p4, %p2595_p3 }
  0x24   : > { %s2613_s18 = scalar_lea.vmem %s2612_s11, 6144  ;;  %p2614_p10 = scmp.lt.s32.totalorder %s248_s30, %s2612_s11 }
  0x25   : > { %p2610_p7 = pneg %p2609_p5  ;;  %p2615_p13 = scmp.lt.s32.totalorder %s2613_s18, %s2606_s7 }
  0x27   : > { %p2616_p12 = por %p2615_p13, %p2614_p10 }
  0x29   : > { %p2617_p6 = pnand %p2616_p12, %p2610_p7 }
  0x2b   : > { %2620 = shalt.err (!%p2617_p6)
}
  0x2c   : > { %s2820_s19 = smov 192   ;;  %s2821_s17 = smov 12  }
  0x2d   : > { %2356 = dma.hbm_to_vmem [thread:$0]  (!%p2943_p0), %s246_s20, 3072, %s248_s30, %s2957_s8, %s2820_s19, %s2820_s19, %s2821_s17  }
  0x2e   : > { %p2971_p4 = pnand %p1984_p1, %p281_p2  ;;  %s225_s7 = scalar_lea.hbm %s3678_s1, %s2327_s15 }
  0x2f   : > { %s219_s18 = scalar_lea.vmem [#allocation4], %s2326_s14  ;;  %s2330_s23 = smul.u32 3, %s2937_s13 }
  0x30   : > { %s226_s2 = sshll.u32 %s219_s18, 4  ;;  %s2331_s12 = smul.u32 48, %s2813_s25  ;;  %s227_s2 = int_to_ptr.vmem [resolvable:$true] %s226_s2 }
  0x31   : > { %s216_s21 = scalar_lea.sflag [#allocation5], %s2937_s13  ;;  %s2634_s5 = scalar_lea.vmem %s227_s2, 3072 }
  0x32   : > { %p2635_p6 = scmp.ne.s32.totalorder %s227_s2, %s2634_s5  ;;  %s2822_s20 = smov [#allocation4]  }
  0x33   : > { %s2639_s30 = sshll.u32 %s2822_s20, 4  ;;  %s2640_s30 = int_to_ptr.vmem [resolvable:$false] %s2639_s30 }
  0x34   : > { %p2637_p12 = pnand %p2635_p6, %p2595_p3  ;;  %s2641_s26 = scalar_lea.vmem %s2640_s30, 6144 }
  0x35   : > { %p2642_p2 = scmp.lt.s32.totalorder %s227_s2, %s2640_s30  ;;  %p2643_p5 = scmp.lt.s32.totalorder %s2641_s26, %s2634_s5 }
  0x36   : > { %p2638_p1 = pneg %p2637_p12 }
  0x37   : > { %p2644_p7 = por %p2643_p5, %p2642_p2 }
  0x39   : > { %p2645_p10 = pnand %p2644_p7, %p2638_p1 }
  0x3b   : > { %2648 = shalt.err (!%p2645_p10)
}
  0x3c   : > { %2353 = dma.hbm_to_vmem [thread:$0]  (!%p2943_p0), %s225_s7, 3072, %s227_s2, %s216_s21, %s2820_s19, %s2820_s19, %s2821_s17  }
  0x3d   : > { %s267_s15 = scalar_lea.hbm %s3680_s3, %s2331_s12  ;;  %s261_s11 = scalar_lea.vmem [#allocation9], %s2330_s23 }
  0x3e   : > { %s269_s28 = sshll.u32 %s261_s11, 4  ;;  %s2823_s5 = smov [#allocation9]   ;;  %s270_s28 = int_to_ptr.vmem [resolvable:$true] %s269_s28 }
  0x3f   : > { %s2662_s18 = scalar_lea.vmem %s270_s28, 48  ;;  %s2667_s26 = sshll.u32 %s2823_s5, 4  ;;  %s2668_s26 = int_to_ptr.vmem [resolvable:$false] %s2667_s26 }
  0x40   : > { %p2663_p13 = scmp.ne.s32.totalorder %s270_s28, %s2662_s18  ;;  %s2669_s20 = scalar_lea.vmem %s2668_s26, 96 }
  0x41   : > { %p2670_p1 = scmp.lt.s32.totalorder %s270_s28, %s2668_s26  ;;  %p2671_p2 = scmp.lt.s32.totalorder %s2669_s20, %s2662_s18 }
  0x42   : > { %p2665_p6 = pnand %p2663_p13, %p2595_p3 }
  0x43   : > { %p2672_p5 = por %p2671_p2, %p2670_p1 }
  0x44   : > { %p2666_p12 = pneg %p2665_p6 }
  0x46   : > { %p2673_p7 = pnand %p2672_p5, %p2666_p12 }
  0x48   : > { %2676 = shalt.err (!%p2673_p7)
}
  0x49   : > { %2359 = dma.hbm_to_vmem [thread:$0]  (!%p2943_p0), %s267_s15, 48, %s270_s28, %s2957_s8  }
  0x4a   : > { %285 = sbr.rel (%p2971_p4) target bundleno = 2239 (0x8bf), region = 36 }
  0x4f   : > { %s3002_s2 = sand.u32 1, %s2801_s22  }
  0x50   : > { %s2332_s21 = smul.u32 192, %s3002_s2  ;;  %s288_s23 = scalar_lea.sflag [#allocation5], %s3002_s2 }
  0x52   : > { %s3006_s12 = scalar_lea.vmem [#allocation4], %s2332_s21 }
  0x53   : > { %2776 = dma.done.wait (%p2917_p8), %s288_s23, 3072  }
  0x54   : > { %2778 = vsyncadd (%p2917_p8), %s288_s23, 4294964224  ;;  %s296_s16 = sand.u32 1, %s2897_s27   ;;  %s3013_s19 = scalar_lea.vmem [#allocation7], %s2332_s21 }
  0x55   : > { %s297_s8 = scalar_lea.sflag [#allocation8], %s296_s16 }
  0x56   : > { %2780 = dma.done.wait (%p2917_p8), %s297_s8, 3120  }
  0x57   : > { %2782 = vsyncadd (%p2917_p8), %s297_s8, 4294964176  ;;  %s2333_s17 = smul.u32 3, %s3002_s2  ;;  %s1985_s29 = sshll.u32 %s3002_s2, 3 }
  0x58   : > { %p350_p0 = scmp.lt.s32.totalorder %s2809_s24, 1  ;;  %p2365_p3 = scmp.eq.s32.totalorder %s2809_s24, 0 }
  0x59   : > { %s2824_s13 = smov [#allocation10]  }
  0x5a   : > { %s351_s7 = scalar_select %p350_p0, %s2809_s24, 1 }
  0x5b   : > { %s369_s14 = sshll.u32 %s2824_s13, 4  ;;  %s3024_s14 = int_to_ptr.vmem [resolvable:$true] %s369_s14 }
  0x5c   : > { %s2334_s30 = smul.u32 3, %s351_s7  ;;  %s3032_s28 = scalar_lea.vmem %s3024_s14, 1024 }
  0x5d   : > { %p2688_p8 = scmp.ne.s32.totalorder %s3024_s14, %s3032_s28  ;;  %p2694_p13 = scmp.lt.s32.totalorder %s3024_s14, %s3024_s14 }
  0x5e   : > { %s3029_s9 = scalar_lea.vmem %s3681_s4, %s2334_s30  ;;  %p2695_p6 = scmp.lt.s32.totalorder %s3032_s28, %s3032_s28 }
  0x5f   : > { %p2689_p4 = pnand %p2688_p8, %p2365_p3 }
  0x60   : > { %p3045_p12 = por %p2695_p6, %p2694_p13 }
  0x61   : > { %p2690_p10 = pneg %p2689_p4 }
  0x63   : > { %p2697_p1 = pnand %p3045_p12, %p2690_p10 }
  0x65   : > { %2700 = shalt.err (!%p2697_p1)  }
  0x66   : > { %2342 = dma.hbm_to_vmem [thread:$0]  (%p2365_p3), %s3677_s0, 1024, %s3024_s14, [#allocation3] }
  0x67   : > { %s3057_s20 = scalar_lea.vmem [#allocation9], %s2333_s17  ;;  %s3059_s21 = scalar_lea.vmem [#allocation11], %s1985_s29 }
  0x68   : > { %2784 = dma.done.wait (%p2365_p3), [#allocation3], 1024 }
  0x69   : > { %2786 = vsyncadd (%p2365_p3), [#allocation3], 4294966272  ;;  %v3691_v0 = vmov 0   ;;  %v2425_v1 = vld [vmem:[%s3006_s12 + $0xac] ss:$12 sps:$4 sm:$0xff]   ;;  %v464_v32 = vld [vmem:[#allocation10 + $0x18] sm:$0xff]  ;;  %v444_v62 = vlaneseq }
  0x6a   : > { %649 = vmatprep.mubr.bf16.mxu0 %v3691_v0  ;;  %v2427_v2 = vld [vmem:[%s3006_s12 + $0xa8] ss:$12 sps:$4 sm:$0xff]   ;;  %617 = vmatprep.subr.bf16.mxu0 %v2425_v1  ;;  %v2430_v4 = vld [vmem:[%s3006_s12 + $0x90] ss:$12 sps:$4 sm:$0xff]   ;;  %v2433_v6 = vld [vmem:[%s3006_s12 + $0x78] ss:$12 sps:$4 sm:$0xff]  }
  0x6b   : > { %v2428_v3 = vld [vmem:[%s3006_s12 + $0x94] ss:$12 sps:$4 sm:$0xff]   ;;  %618 = vmatpush1.bf16.msra.mxu0 %v2427_v2  ;;  %v2431_v5 = vld [vmem:[%s3006_s12 + $0x7c] ss:$12 sps:$4 sm:$0xff]   ;;  %v2434_v7 = vld [vmem:[%s3006_s12 + $0x64] ss:$12 sps:$4 sm:$0xff]  }
  0x6c   : > { %619 = vmatprep.subr.bf16.mxu0 %v2428_v3  ;;  %v2436_v8 = vld [vmem:[%s3006_s12 + $0x60] ss:$12 sps:$4 sm:$0xff]   ;;  %v2449_v10 = vld [vmem:[%s3006_s12 + $0xb0] ss:$12 sps:$4 sm:$0xff]   ;;  %v2452_v14 = vld [vmem:[%s3006_s12 + $0x98] ss:$12 sps:$4 sm:$0xff]  }
  0x6d   : > { %v2437_v9 = vld [vmem:[%s3006_s12 + $0x4c] ss:$12 sps:$4 sm:$0xff]   ;;  %2142 = vmatprep.subr.bf16.mxu1 %v2449_v10  ;;  %v2439_v15 = vld [vmem:[%s3006_s12 + $0x48] ss:$12 sps:$4 sm:$0xff]   ;;  %v2442_v18 = vld [vmem:[%s3006_s12 + $0x30] ss:$12 sps:$4 sm:$0xff]  }
  0x6e   : > { %v461_v11 = vld [vmem:[#allocation10] sm:$0xff]  ;;  %v462_v12 = vld [vmem:[#allocation10 + $0x8] sm:$0xff]  ;;  %2143 = vmatpush3.bf16.msra.mxu1 %v2449_v10  ;;  %v463_v31 = vld [vmem:[#allocation10 + $0x10] sm:$0xff]  ;;  %v3693_v44 = vmov 0.0   ;;  %vm2827_vm0 = vmmov 0   ;;  %v3239_v63 = vshrl.u32 %v444_v62, 7 }
  0x6f   : > { %620 = vmatpush1.bf16.msra.mxu0 %v2430_v4  ;;  %v469_v13 = vpack.c.bf16 %v462_v12, %v461_v11  ;;  %v2440_v16 = vld [vmem:[%s3006_s12 + $0x34] ss:$12 sps:$4 sm:$0xff]   ;;  %2144 = vmatprep.subr.bf16.mxu1 %v2452_v14  ;;  %v2443_v20 = vld [vmem:[%s3006_s12 + $0x1c] ss:$12 sps:$4 sm:$0xff]   ;;  %v2445_v21 = vld [vmem:[%s3006_s12 + $0x18] ss:$12 sps:$4 sm:$0xff]   ;;  %v470_v35 = vpack.c.bf16 %v464_v32, %v463_v31 }
  0x70   : > { %621 = vmatprep.subr.bf16.mxu0 %v2431_v5  ;;  %v2456_v17 = vld [vmem:[%s3006_s12 + $0x80] ss:$12 sps:$4 sm:$0xff]   ;;  %v2460_v19 = vld [vmem:[%s3006_s12 + $0x68] ss:$12 sps:$4 sm:$0xff]   ;;  %v2464_v22 = vld [vmem:[%s3006_s12 + $0x50] ss:$12 sps:$4 sm:$0xff]  }
  0x71   : > { %2158 = vmatprep.mubr.bf16.mxu1 %v469_v13  ;;  %v2446_v23 = vld [vmem:[%s3006_s12 + $0x4] ss:$12 sps:$4 sm:$0xff]   ;;  %v2448_v24 = vld [vmem:[%s3006_s12] ss:$12 sps:$4 sm:$0xff]   ;;  %v3092_v27 = vld [vmem:[%s3013_s19 + $0xa8] ss:$12 sps:$4 sm:$0xff]  }
  0x72   : > { %2145 = vmatpush3.bf16.msra.mxu1 %v2452_v14  ;;  %v2468_v25 = vld [vmem:[%s3006_s12 + $0x38] ss:$12 sps:$4 sm:$0xff]   ;;  %v3095_v28 = vld [vmem:[%s3013_s19 + $0x94] ss:$12 sps:$4 sm:$0xff]   ;;  %v3100_v30 = vld [vmem:[%s3013_s19 + $0x90] ss:$12 sps:$4 sm:$0xff]  }
  0x73   : > { %622 = vmatpush1.bf16.msra.mxu0 %v2433_v6  ;;  %2146 = vmatprep.subr.bf16.mxu1 %v2456_v17  ;;  %v3089_v26 = vld [vmem:[%s3013_s19 + $0xac] ss:$12 sps:$4 sm:$0xff]   ;;  %v2476_v33 = vld [vmem:[%s3006_s12 + $0x8] ss:$12 sps:$4 sm:$0xff]   ;;  %v3115_v37 = vld [vmem:[%s3013_s19 + $0x64] ss:$12 sps:$4 sm:$0xff]  }
  0x74   : > { %623 = vmatprep.subr.bf16.mxu0 %v2434_v7  ;;  %v2472_v29 = vld [vmem:[%s3006_s12 + $0x20] ss:$12 sps:$4 sm:$0xff]   ;;  %v3107_v34 = vld [vmem:[%s3013_s19 + $0x7c] ss:$12 sps:$4 sm:$0xff]   ;;  %v3111_v36 = vld [vmem:[%s3013_s19 + $0x78] ss:$12 sps:$4 sm:$0xff]  }
  0x75   : > { %v465_v38 = vld [vmem:[#allocation10 + $0x20] sm:$0xff]  ;;  %v466_v39 = vld [vmem:[#allocation10 + $0x28] sm:$0xff]  ;;  %v467_v48 = vld [vmem:[#allocation10 + $0x30] sm:$0xff]  ;;  %v446_v1 = vsub.s32 0, %v3239_v63  ;;  %v450_v4 = vsub.s32 1, %v3239_v63  ;;  %s2053_s23 = sshll.u32 %s2809_s24, 7 }
  0x76   : > { %2147 = vmatpush3.bf16.msra.mxu1 %v2456_v17  ;;  %v3118_v40 = vld [vmem:[%s3013_s19 + $0xb0] ss:$12 sps:$4 sm:$0xff]   ;;  %v3122_v41 = vld [vmem:[%s3013_s19 + $0x60] ss:$12 sps:$4 sm:$0xff]   ;;  %v471_v42 = vpack.c.bf16 %v466_v39, %v465_v38  ;;  %v3132_v45 = vld [vmem:[%s3013_s19 + $0x98] ss:$12 sps:$4 sm:$0xff]  }
  0x77   : > { %624 = vmatpush1.bf16.msra.mxu0 %v2436_v8  ;;  %2148 = vmatprep.subr.bf16.mxu1 %v2460_v19  ;;  %v3127_v43 = vld [vmem:[%s3013_s19 + $0x4c] ss:$12 sps:$4 sm:$0xff]   ;;  %v3136_v46 = vld [vmem:[%s3013_s19 + $0x48] ss:$12 sps:$4 sm:$0xff]   ;;  %v468_v49 = vld [vmem:[#allocation10 + $0x38] sm:$0xff]  ;;  %v3695_v8 = vsub.s32 2, %v3239_v63 }
  0x78   : > { %625 = vmatprep.subr.bf16.mxu0 %v2437_v9  ;;  %v3141_v47 = vld [vmem:[%s3013_s19 + $0x34] ss:$12 sps:$4 sm:$0xff]   ;;  %v3149_v51 = vld [vmem:[%s3013_s19 + $0x30] ss:$12 sps:$4 sm:$0xff]   ;;  %v472_v52 = vpack.c.bf16 %v468_v49, %v467_v48  ;;  %v3165_v55 = vld [vmem:[%s3013_s19 + $0x18] ss:$12 sps:$4 sm:$0xff]  }
  0x79   : > { %v3145_v50 = vld [vmem:[%s3013_s19 + $0x80] ss:$12 sps:$4 sm:$0xff]   ;;  %v3154_v53 = vld [vmem:[%s3013_s19 + $0x1c] ss:$12 sps:$4 sm:$0xff]   ;;  %v3170_v56 = vld [vmem:[%s3013_s19 + $0x4] ss:$12 sps:$4 sm:$0xff]  }
  0x7a   : > { %2149 = vmatpush3.bf16.msra.mxu1 %v2460_v19  ;;  %v3159_v54 = vld [vmem:[%s3013_s19 + $0x68] ss:$12 sps:$4 sm:$0xff]   ;;  %v3174_v57 = vld [vmem:[%s3013_s19 + $0x50] ss:$12 sps:$4 sm:$0xff]   ;;  %v3178_v58 = vld [vmem:[%s3013_s19] ss:$12 sps:$4 sm:$0xff]  }
  0x7b   : > { %626 = vmatpush1.bf16.msra.mxu0 %v2439_v15  ;;  %2150 = vmatprep.subr.bf16.mxu1 %v2464_v22  ;;  %v3185_v59 = vld [vmem:[%s3013_s19 + $0x38] ss:$12 sps:$4 sm:$0xff]   ;;  %v3193_v60 = vld [vmem:[%s3013_s19 + $0x20] ss:$12 sps:$4 sm:$0xff]   ;;  %v3201_v61 = vld [vmem:[%s3013_s19 + $0x8] ss:$12 sps:$4 sm:$0xff]  }
  0x7c   : > { %627 = vmatprep.subr.bf16.mxu0 %v2440_v16  ;;  %v441_v2 = vld [vmem:[%s3057_s20] sm:$0x7]  ;;  %s1813_s12 = sshll.u32 %s3059_s21, 4  ;;  %p3731_p2 = scmp.eq.s32.totalorder %s2897_s27, 1  ;;  %s3613_s12 = int_to_ptr.vmem [resolvable:$true] %s1813_s12 }
  0x7d   : > { %v477_v6 = vrot.slane %v441_v2, %v446_v1  ;;  %v481_v9 = vrot.slane %v441_v2, %v450_v4  ;;  %v3251_v14 = vrot.slane %v441_v2, %v3695_v8 }
  0x7e   : > { %2151 = vmatpush3.bf16.msra.mxu1 %v2464_v22  ;;  %p2703_p5 = pnand %p2688_p8, %p3731_p2 }
  0x7f   : > { %628 = vmatpush1.bf16.msra.mxu0 %v2442_v18  ;;  %2152 = vmatprep.subr.bf16.mxu1 %v2468_v25 }
  0x80   : > { %629 = vmatprep.subr.bf16.mxu0 %v2443_v20  ;;  %p2704_p7 = pneg %p2703_p5 }
  0x82   : > { %2153 = vmatpush3.bf16.msra.mxu1 %v2468_v25  ;;  %p2711_p0 = pnand %p2704_p7, %p3045_p12 }
  0x83   : > { %630 = vmatpush1.bf16.msra.mxu0 %v2445_v21  ;;  %2154 = vmatprep.subr.bf16.mxu1 %v2472_v29 }
  0x84   : > { %631 = vmatprep.subr.bf16.mxu0 %v2446_v23 }
  0x86   : > { %2155 = vmatpush3.bf16.msra.mxu1 %v2472_v29 }
  0x87   : > { %632 = vmatpush1.bf16.msra.mxu0 %v2448_v24  ;;  %2156 = vmatprep.subr.bf16.mxu1 %v2476_v33 }
  0x88   : > { %910 = vmatprep.subr.bf16.mxu0 %v3089_v26 }
  0x8a   : > { %650 = vmatmul.mubr.bf16.vlgmr.msra.gmra.mxu0 %v469_v13  ;;  %2157 = vmatpush3.bf16.msra.mxu1 %v2476_v33 }
  0x8b   : > { %911 = vmatpush1.bf16.msra.mxu0 %v3092_v27  ;;  %659 = vmatprep.mubr.bf16.mxu0 %v3691_v0 }
  0x8c   : > { %912 = vmatprep.subr.bf16.mxu0 %v3095_v28  ;;  %2166 = vmatprep.subr.bf16.mxu1 %v3693_v44 }
  0x8d   : > { %2159 = vmatmul.mubr.bf16.vlgmr.msra.gmra.mxu1 %v470_v35 }
  0x8e   : > { %2167 = vmatpush3.bf16.msra.mxu1 %v3118_v40  ;;  %2162 = vmatprep.mubr.bf16.mxu1 %v471_v42 }
  0x8f   : > { %913 = vmatpush1.bf16.msra.mxu0 %v3100_v30  ;;  %2168 = vmatprep.subr.bf16.mxu1 %v3693_v44 }
  0x90   : > { %914 = vmatprep.subr.bf16.mxu0 %v3107_v34 }
  0x92   : > { %660 = vmatmul.mubr.bf16.gmra.mxu0 %v470_v35  ;;  %2169 = vmatpush3.bf16.msra.mxu1 %v3132_v45 }
  0x93   : > { %915 = vmatpush1.bf16.msra.mxu0 %v3111_v36  ;;  %669 = vmatprep.mubr.bf16.mxu0 %v3691_v0 }
  0x94   : > { %916 = vmatprep.subr.bf16.mxu0 %v3115_v37  ;;  %2170 = vmatprep.subr.bf16.mxu1 %v3693_v44 }
  0x95   : > { %2163 = vmatmul.mubr.bf16.gmra.mxu1 %v472_v52 }
  0x96   : > { %2171 = vmatpush3.bf16.msra.mxu1 %v3145_v50  ;;  %2182 = vmatprep.mubr.msk.bf16.mxu1 %vm2827_vm0, %v3693_v44 }
  0x97   : > { %917 = vmatpush1.bf16.msra.mxu0 %v3122_v41  ;;  %2172 = vmatprep.subr.bf16.mxu1 %v3693_v44 }
  0x98   : > { %918 = vmatprep.subr.bf16.mxu0 %v3127_v43 }
  0x9a   : > { %670 = vmatmul.mubr.bf16.gmra.mxu0 %v471_v42  ;;  %2173 = vmatpush3.bf16.msra.mxu1 %v3159_v54 }
  0x9b   : > { %919 = vmatpush1.bf16.msra.mxu0 %v3136_v46  ;;  %679 = vmatprep.mubr.bf16.mxu0 %v3691_v0 }
  0x9c   : > { %920 = vmatprep.subr.bf16.mxu0 %v3141_v47  ;;  %2174 = vmatprep.subr.bf16.mxu1 %v3693_v44 }
  0x9e   : > { %2175 = vmatpush3.bf16.msra.mxu1 %v3174_v57 }
  0x9f   : > { %921 = vmatpush1.bf16.msra.mxu0 %v3149_v51  ;;  %2176 = vmatprep.subr.bf16.mxu1 %v3693_v44 }
  0xa0   : > { %922 = vmatprep.subr.bf16.mxu0 %v3154_v53 }
  0xa2   : > { %680 = vmatmul.mubr.bf16.gmra.mxu0 %v472_v52  ;;  %2177 = vmatpush3.bf16.msra.mxu1 %v3185_v59 }
  0xa3   : > { %923 = vmatpush1.bf16.msra.mxu0 %v3165_v55  ;;  %942 = vmatprep.mubr.bf16.mxu0 %v3691_v0 }
  0xa4   : > { %924 = vmatprep.subr.bf16.mxu0 %v3170_v56  ;;  %2178 = vmatprep.subr.bf16.mxu1 %v3693_v44 }
  0xa6   : > { %2179 = vmatpush3.bf16.msra.mxu1 %v3193_v60 }
  0xa7   : > { %925 = vmatpush1.bf16.msra.mxu0 %v3178_v58  ;;  %2180 = vmatprep.subr.bf16.mxu1 %v3693_v44 }
  0xa8   : > { %1017 = vmatprep.subr.bf16.mxu0 %v3089_v26 }
  0xaa   : > { %943 = vmatmul.mubr.bf16.vlgmr.msra.gmra.mxu0 %v3691_v0  ;;  %2181 = vmatpush3.bf16.msra.mxu1 %v3201_v61 }
  0xab   : > { %1018 = vmatpush1.bf16.msra.mxu0 %v3092_v27  ;;  %1049 = vmatprep.mubr.bf16.mxu0 %v3691_v0 }
  0xac   : > { %1019 = vmatprep.subr.bf16.mxu0 %v3095_v28  ;;  %2186 = vmatprep.subr.bf16.mxu1 %v3693_v44 }
  0xad   : > { %2183 = vmatmul.mubr.bf16.vlgmr.msra.gmra.mxu1 %v3691_v0 }
  0xae   : > { %2187 = vmatpush3.bf16.msra.mxu1 %v3118_v40  ;;  %2202 = vmatprep.mubr.msk.bf16.mxu1 %vm2827_vm0, %v3693_v44 }
  0xaf   : > { %1020 = vmatpush1.bf16.msra.mxu0 %v3100_v30  ;;  %2188 = vmatprep.subr.bf16.mxu1 %v3693_v44 }
  0xb0   : > { %1021 = vmatprep.subr.bf16.mxu0 %v3107_v34 }
  0xb2   : > { %2189 = vmatpush3.bf16.msra.mxu1 %v3132_v45 }
  0xb3   : > { %1022 = vmatpush1.bf16.msra.mxu0 %v3111_v36  ;;  %2190 = vmatprep.subr.bf16.mxu1 %v3693_v44 }
  0xb4   : > { %1023 = vmatprep.subr.bf16.mxu0 %v3115_v37 }
  0xb6   : > { %2191 = vmatpush3.bf16.msra.mxu1 %v3145_v50 }
  0xb7   : > { %1024 = vmatpush1.bf16.msra.mxu0 %v3122_v41  ;;  %2192 = vmatprep.subr.bf16.mxu1 %v3693_v44 }
  0xb8   : > { %1025 = vmatprep.subr.bf16.mxu0 %v3127_v43 }
  0xba   : > { %2193 = vmatpush3.bf16.msra.mxu1 %v3159_v54 }
  0xbb   : > { %1026 = vmatpush1.bf16.msra.mxu0 %v3136_v46  ;;  %2194 = vmatprep.subr.bf16.mxu1 %v3693_v44 }
  0xbc   : > { %1027 = vmatprep.subr.bf16.mxu0 %v3141_v47 }
  0xbe   : > { %2195 = vmatpush3.bf16.msra.mxu1 %v3174_v57 }
  0xbf   : > { %1028 = vmatpush1.bf16.msra.mxu0 %v3149_v51  ;;  %2196 = vmatprep.subr.bf16.mxu1 %v3693_v44 }
  0xc0   : > { %1029 = vmatprep.subr.bf16.mxu0 %v3154_v53 }
  0xc2   : > { %2197 = vmatpush3.bf16.msra.mxu1 %v3185_v59 }
  0xc3   : > { %1030 = vmatpush1.bf16.msra.mxu0 %v3165_v55  ;;  %2198 = vmatprep.subr.bf16.mxu1 %v3693_v44 }
  0xc4   : > { %1031 = vmatprep.subr.bf16.mxu0 %v3170_v56 }
  0xc6   : > { %2199 = vmatpush3.bf16.msra.mxu1 %v3193_v60 }
  0xc7   : > { %1032 = vmatpush1.bf16.msra.mxu0 %v3178_v58  ;;  %2200 = vmatprep.subr.bf16.mxu1 %v3693_v44 }
  0xc8   : > { %1127 = vmatprep.subr.bf16.mxu0 %v3089_v26 }
  0xca   : > { %2201 = vmatpush3.bf16.msra.mxu1 %v3201_v61 }
  0xcb   : > { %2206 = vmatprep.subr.bf16.mxu1 %v3693_v44 }
 0x14a   : > { %v651_v3 = vpop.f32.mrf.mxu0 }
 0x14b   : > { %v652_v44 = vadd.f32 %v651_v3, %v477_v6 }
 0x14c   : > { %v653_v5 = vpop.f32.mrf.mxu0 }
 0x14d   : > { %v2160_v18 = vpop.f32.mrf.mxu1 }
 0x14e   : > { %v655_v7 = vpop.f32.mrf.mxu0  ;;  %v3258_v20 = vadd.f32 %v2160_v18, %v3251_v14 }
 0x14f   : > { %v3245_v10 = vadd.f32 %v655_v7, %v477_v6  ;;  %v724_v22 = vpop.f32.mrf.mxu1 }
 0x150   : > { %v657_v11 = vpop.f32.mrf.mxu0 }
 0x151   : > { %v3247_v12 = vadd.f32 %v657_v11, %v481_v9  ;;  %v2161_v25 = vpop.f32.mrf.mxu1 }
 0x152   : > { %v661_v13 = vpop.f32.mrf.mxu0  ;;  %v3265_v31 = vadd.f32 %v2161_v25, %v3251_v14 }
 0x153   : > { %v3253_v15 = vadd.f32 %v661_v13, %v477_v6  ;;  %v727_v33 = vpop.f32.mrf.mxu1 }
 0x154   : > { %v663_v16 = vpop.f32.mrf.mxu0  ;;  %v3270_v38 = vadd.f32 %v727_v33, %v3251_v14 }
 0x155   : > { %v3255_v17 = vadd.f32 %v663_v16, %v481_v9  ;;  %v2164_v42 = vpop.f32.mrf.mxu1 }
 0x156   : > { %v665_v19 = vpop.f32.mrf.mxu0  ;;  %v3275_v49 = vadd.f32 %v2164_v42, %v3251_v14 }
 0x157   : > { %v3260_v21 = vadd.f32 %v665_v19, %v477_v6  ;;  %v740_v62 = vpop.f32.mrf.mxu1 }
 0x158   : > { %v667_v23 = vpop.f32.mrf.mxu0  ;;  %3712 = vst [vmem:[#allocation28_spill] sm:$0xff] %v3275_v49  ;;  %v3280_v7 = vadd.f32 %v740_v62, %v3251_v14 }
 0x159   : > { %v3262_v24 = vadd.f32 %v667_v23, %v481_v9  ;;  %v2165_v13 = vpop.f32.mrf.mxu1 }
 0x15a   : > { %v671_v29 = vpop.f32.mrf.mxu0  ;;  %v3285_v18 = vadd.f32 %v2165_v13, %v3251_v14 }
 0x15b   : > { %v3267_v32 = vadd.f32 %v671_v29, %v477_v6  ;;  %v743_v23 = vpop.f32.mrf.mxu1  ;;  %v442_v29 = vld [vmem:[%s3029_s9] sm:$0x7] }
 0x15c   : > { %v673_v35 = vpop.f32.mrf.mxu0  ;;  %3714 = vst [vmem:[#allocation30_spill] sm:$0xff] %v3285_v18  ;;  %v3291_v33 = vadd.f32 %v743_v23, %v3251_v14  ;;  %v3297_v62 = vrot.slane %v442_v29, %v446_v1  ;;  %v3302_v23 = vrot.slane %v442_v29, %v450_v4  ;;  %v654_v1 = vadd.f32 %v653_v5, %v481_v9 }
 0x15d   : > { %v3272_v39 = vadd.f32 %v673_v35, %v481_v9 }
 0x15e   : > { %v675_v48 = vpop.f32.mrf.mxu0  ;;  %3716 = vst [vmem:[#allocation32_spill] sm:$0xff] %v3291_v33 }
 0x15f   : > { %v3277_v52 = vadd.f32 %v675_v48, %v477_v6 }
 0x160   : > { %v677_v2 = vpop.f32.mrf.mxu0 }
 0x161   : > { %v3282_v11 = vadd.f32 %v677_v2, %v481_v9 }
 0x162   : > { %v681_v16 = vpop.f32.mrf.mxu0 }
 0x163   : > { %3713 = vst [vmem:[#allocation29_spill] sm:$0xff] %v3282_v11  ;;  %v3287_v19 = vadd.f32 %v681_v16, %v477_v6 }
 0x164   : > { %v683_v25 = vpop.f32.mrf.mxu0 }
 0x165   : > { %3715 = vst [vmem:[#allocation31_spill] sm:$0xff] %v3287_v19  ;;  %v3293_v35 = vadd.f32 %v683_v25, %v481_v9 }
 0x166   : > { %v685_v42 = vpop.f32.mrf.mxu0 }
 0x167   : > { %3717 = vst [vmem:[#allocation33_spill] sm:$0xff] %v3293_v35  ;;  %v3295_v48 = vadd.f32 %v685_v42, %v477_v6 }
 0x168   : > { %v687_v2 = vpop.f32.mrf.mxu0 }
 0x169   : > { %3718 = vst [vmem:[#allocation34_spill] sm:$0xff] %v3295_v48  ;;  %v3299_v0 = vadd.f32 %v687_v2, %v481_v9 }
 0x16a   : > { %v944_v13 = vpop.f32.mrf.mxu0 }
 0x16b   : > { %3719 = vst [vmem:[#allocation35_spill] sm:$0xff] %v3299_v0  ;;  %v945_v16 = vadd.f32 %v944_v13, %v3297_v62 }
 0x16c   : > { %v946_v8 = vpop.f32.mrf.mxu0 }
 0x16d   : > { %v991_v18 = vadd.f32 %v945_v16, %v652_v44  ;;  %v947_v42 = vadd.f32 %v946_v8, %v3302_v23  ;;  %v985_v48 = vpop.f32.mrf.mxu1  ;;  %v3720_v44 = vsub.s32 2, %v3239_v63  ;;  %v725_v8 = vadd.f32 %v724_v22, %v3251_v14 }
 0x16e   : > { %v948_v49 = vpop.f32.mrf.mxu0  ;;  %v3721_v14 = vmov 0.0   ;;  %v3722_v22 = vmov 0  }
 0x16f   : > { %v2035_v19 = vmul.f32 -1.442695, %v991_v18  ;;  %v2184_v35 = vpop.f32.mrf.mxu1  ;;  %v998_v33 = vadd.f32 %v947_v42, %v654_v1  ;;  %v3307_v49 = vrot.slane %v442_v29, %v3720_v44 }
 0x170   : > { %v949_v25 = vpop.f32.mrf.mxu0 }
 0x171   : > { %2489 = vpow2.f32 %v2035_v19  ;;  %v988_v2 = vpop.f32.mrf.mxu1  ;;  %v2036_v11 = vmul.f32 -1.442695, %v998_v33  ;;  %v986_v4 = vadd.f32 %v985_v48, %v3307_v49 }
 0x173   : > { %v2185_v0 = vpop.f32.mrf.mxu1  ;;  %2491 = vpow2.f32 %v2036_v11 }
 0x17e   : > { %v2490_v3 = vpop.eup %2489 }
 0x17f   : > { %v995_v6 = vadd.f32 1.0, %v2490_v3 }
 0x180   : > { %v2492_v18 = vpop.eup %2491 }
 0x181   : > { %2493 = vrcp.f32 %v995_v6  ;;  %v1002_v9 = vadd.f32 1.0, %v2492_v18 }
 0x18e   : > { %v2494_v19 = vpop.eup %2493 }
 0x18f   : > { %v1005_v5 = vmul.f32 %v2494_v19, %v986_v4 }
 0x191   : > { %v1006_v35 = vadd.f32 %v1005_v5, %v725_v8 }
 0x193   : > { %2495 = vtanh.f32 %v1006_v35 }
 0x194   : > { %2497 = vrcp.f32 %v1002_v9 }
 0x1a0   : > { %v2496_v0 = vpop.eup %2495 }
 0x1a1   : > { %v1008_v33 = vsub.f32 0.0, %v2496_v0  ;;  %v2498_v13 = vpop.eup %2497 }
 0x1a3   : > { %v1009_v11 = vmul.f32 %v2498_v13, %v1008_v33 }
 0x1a5   : > { %v3311_v16 = vadd.f32 %v2496_v0, %v1009_v11 }
 0x1a7   : > { %1011 = vst [vmem:[#allocation10] sm:$0xff] %v3311_v16  ;;  %v1016_v63 = vpack.c.bf16 %v3311_v16, %v3311_v16 }
 0x1a9   : > { %1050 = vmatmul.mubr.bf16.vlgmr.msra.gmra.mxu0 %v1016_v63  ;;  %2203 = vmatmul.mubr.bf16.vlgmr.msra.gmra.mxu1 %v1016_v63 }
 0x1aa   : > { %1128 = vmatpush1.bf16.msra.mxu0 %v3092_v27  ;;  %2207 = vmatpush3.bf16.msra.mxu1 %v3118_v40 }
 0x1ab   : > { %1129 = vmatprep.subr.bf16.mxu0 %v3095_v28  ;;  %2208 = vmatprep.subr.bf16.mxu1 %v3721_v14 }
 0x1ac   : > { %1159 = vmatprep.mubr.bf16.mxu0 %v3722_v22  ;;  %2222 = vmatprep.mubr.msk.bf16.mxu1 %vm2827_vm0, %v3721_v14 }
 0x1ae   : > { %1130 = vmatpush1.bf16.msra.mxu0 %v3100_v30  ;;  %2209 = vmatpush3.bf16.msra.mxu1 %v3132_v45 }
 0x1af   : > { %1131 = vmatprep.subr.bf16.mxu0 %v3107_v34  ;;  %2210 = vmatprep.subr.bf16.mxu1 %v3721_v14 }
 0x1b2   : > { %1132 = vmatpush1.bf16.msra.mxu0 %v3111_v36  ;;  %2211 = vmatpush3.bf16.msra.mxu1 %v3145_v50 }
 0x1b3   : > { %1133 = vmatprep.subr.bf16.mxu0 %v3115_v37  ;;  %2212 = vmatprep.subr.bf16.mxu1 %v3721_v14 }
 0x1b6   : > { %1134 = vmatpush1.bf16.msra.mxu0 %v3122_v41  ;;  %2213 = vmatpush3.bf16.msra.mxu1 %v3159_v54 }
 0x1b7   : > { %1135 = vmatprep.subr.bf16.mxu0 %v3127_v43  ;;  %2214 = vmatprep.subr.bf16.mxu1 %v3721_v14 }
 0x1ba   : > { %1136 = vmatpush1.bf16.msra.mxu0 %v3136_v46  ;;  %2215 = vmatpush3.bf16.msra.mxu1 %v3174_v57 }
 0x1bb   : > { %1137 = vmatprep.subr.bf16.mxu0 %v3141_v47  ;;  %2216 = vmatprep.subr.bf16.mxu1 %v3721_v14 }
 0x1be   : > { %1138 = vmatpush1.bf16.msra.mxu0 %v3149_v51  ;;  %2217 = vmatpush3.bf16.msra.mxu1 %v3185_v59 }
 0x1bf   : > { %1139 = vmatprep.subr.bf16.mxu0 %v3154_v53  ;;  %2218 = vmatprep.subr.bf16.mxu1 %v3721_v14 }
 0x1c2   : > { %1140 = vmatpush1.bf16.msra.mxu0 %v3165_v55  ;;  %2219 = vmatpush3.bf16.msra.mxu1 %v3193_v60 }
 0x1c3   : > { %1141 = vmatprep.subr.bf16.mxu0 %v3170_v56  ;;  %2220 = vmatprep.subr.bf16.mxu1 %v3721_v14 }
 0x1c6   : > { %1142 = vmatpush1.bf16.msra.mxu0 %v3178_v58  ;;  %2221 = vmatpush3.bf16.msra.mxu1 %v3201_v61 }
 0x1c7   : > { %1237 = vmatprep.subr.bf16.mxu0 %v3089_v26  ;;  %2226 = vmatprep.subr.bf16.mxu1 %v3721_v14 }
 0x269   : > { %v1051_v29 = vpop.f32.mrf.mxu0  ;;  %v1092_v48 = vpop.f32.mrf.mxu1 }
 0x26a   : > { %v1052_v25 = vadd.f32 %v1051_v29, %v3297_v62  ;;  %v1093_v33 = vadd.f32 %v1092_v48, %v3307_v49 }
 0x26b   : > { %v1053_v42 = vpop.f32.mrf.mxu0  ;;  %v2204_v1 = vpop.f32.mrf.mxu1 }
 0x26c   : > { %v1098_v2 = vadd.f32 %v1052_v25, %v3245_v10  ;;  %v1054_v19 = vadd.f32 %v1053_v42, %v3302_v23 }
 0x26d   : > { %v1055_v3 = vpop.f32.mrf.mxu0  ;;  %v1095_v6 = vpop.f32.mrf.mxu1 }
 0x26e   : > { %v2037_v44 = vmul.f32 -1.442695, %v1098_v2  ;;  %v1105_v8 = vadd.f32 %v1054_v19, %v3247_v12 }
 0x26f   : > { %v1056_v4 = vpop.f32.mrf.mxu0  ;;  %v2205_v18 = vpop.f32.mrf.mxu1 }
 0x270   : > { %2499 = vpow2.f32 %v2037_v44  ;;  %v2038_v5 = vmul.f32 -1.442695, %v1105_v8 }
 0x272   : > { %2501 = vpow2.f32 %v2038_v5 }
 0x27d   : > { %v2500_v9 = vpop.eup %2499 }
 0x27e   : > { %v1102_v35 = vadd.f32 1.0, %v2500_v9 }
 0x27f   : > { %v2502_v0 = vpop.eup %2501 }
 0x280   : > { %2503 = vrcp.f32 %v1102_v35  ;;  %v1109_v63 = vadd.f32 1.0, %v2502_v0 }
 0x28d   : > { %v2504_v13 = vpop.eup %2503 }
 0x28e   : > { %v1112_v10 = vmul.f32 %v2504_v13, %v1093_v33 }
 0x290   : > { %v1113_v11 = vadd.f32 %v1112_v10, %v3270_v38 }
 0x292   : > { %2505 = vtanh.f32 %v1113_v11 }
 0x293   : > { %2507 = vrcp.f32 %v1109_v63 }
 0x29f   : > { %v2506_v29 = vpop.eup %2505 }
 0x2a0   : > { %v1115_v25 = vsub.f32 %v3311_v16, %v2506_v29  ;;  %v2508_v42 = vpop.eup %2507 }
 0x2a2   : > { %v1116_v12 = vmul.f32 %v2508_v42, %v1115_v25 }
 0x2a4   : > { %v3358_v1 = vadd.f32 %v2506_v29, %v1116_v12 }
 0x2a6   : > { %1121 = vst [vmem:[#allocation10 + $0x8] sm:$0xff] %v3358_v1  ;;  %v1126_v2 = vpack.c.bf16 %v3358_v1, %v3358_v1 }
 0x2a8   : > { %1160 = vmatmul.mubr.bf16.vlgmr.msra.gmra.mxu0 %v1126_v2  ;;  %2223 = vmatmul.mubr.bf16.vlgmr.msra.gmra.mxu1 %v1126_v2 }
 0x2a9   : > { %1238 = vmatpush1.bf16.msra.mxu0 %v3092_v27  ;;  %2227 = vmatpush3.bf16.msra.mxu1 %v3118_v40 }
 0x2aa   : > { %1239 = vmatprep.subr.bf16.mxu0 %v3095_v28  ;;  %2228 = vmatprep.subr.bf16.mxu1 %v3721_v14 }
 0x2ab   : > { %1269 = vmatprep.mubr.bf16.mxu0 %v3722_v22  ;;  %2242 = vmatprep.mubr.msk.bf16.mxu1 %vm2827_vm0, %v3721_v14 }
 0x2ad   : > { %1240 = vmatpush1.bf16.msra.mxu0 %v3100_v30  ;;  %2229 = vmatpush3.bf16.msra.mxu1 %v3132_v45 }
 0x2ae   : > { %1241 = vmatprep.subr.bf16.mxu0 %v3107_v34  ;;  %2230 = vmatprep.subr.bf16.mxu1 %v3721_v14 }
 0x2b1   : > { %1242 = vmatpush1.bf16.msra.mxu0 %v3111_v36  ;;  %2231 = vmatpush3.bf16.msra.mxu1 %v3145_v50 }
 0x2b2   : > { %1243 = vmatprep.subr.bf16.mxu0 %v3115_v37  ;;  %2232 = vmatprep.subr.bf16.mxu1 %v3721_v14 }
 0x2b5   : > { %1244 = vmatpush1.bf16.msra.mxu0 %v3122_v41  ;;  %2233 = vmatpush3.bf16.msra.mxu1 %v3159_v54 }
 0x2b6   : > { %1245 = vmatprep.subr.bf16.mxu0 %v3127_v43  ;;  %2234 = vmatprep.subr.bf16.mxu1 %v3721_v14 }
 0x2b9   : > { %1246 = vmatpush1.bf16.msra.mxu0 %v3136_v46  ;;  %2235 = vmatpush3.bf16.msra.mxu1 %v3174_v57 }
 0x2ba   : > { %1247 = vmatprep.subr.bf16.mxu0 %v3141_v47  ;;  %2236 = vmatprep.subr.bf16.mxu1 %v3721_v14 }
 0x2bd   : > { %1248 = vmatpush1.bf16.msra.mxu0 %v3149_v51  ;;  %2237 = vmatpush3.bf16.msra.mxu1 %v3185_v59 }
 0x2be   : > { %1249 = vmatprep.subr.bf16.mxu0 %v3154_v53  ;;  %2238 = vmatprep.subr.bf16.mxu1 %v3721_v14 }
 0x2c1   : > { %1250 = vmatpush1.bf16.msra.mxu0 %v3165_v55  ;;  %2239 = vmatpush3.bf16.msra.mxu1 %v3193_v60 }
 0x2c2   : > { %1251 = vmatprep.subr.bf16.mxu0 %v3170_v56  ;;  %2240 = vmatprep.subr.bf16.mxu1 %v3721_v14 }
 0x2c5   : > { %1252 = vmatpush1.bf16.msra.mxu0 %v3178_v58  ;;  %2241 = vmatpush3.bf16.msra.mxu1 %v3201_v61 }
 0x2c6   : > { %1347 = vmatprep.subr.bf16.mxu0 %v3089_v26  ;;  %2246 = vmatprep.subr.bf16.mxu1 %v3721_v14 }
 0x368   : > { %v1161_v38 = vpop.f32.mrf.mxu0  ;;  %v1202_v16 = vpop.f32.mrf.mxu1 }
 0x369   : > { %v1162_v48 = vadd.f32 %v1161_v38, %v3297_v62  ;;  %v1203_v11 = vadd.f32 %v1202_v16, %v3307_v49 }
 0x36a   : > { %v1163_v3 = vpop.f32.mrf.mxu0  ;;  %v2224_v6 = vpop.f32.mrf.mxu1 }
 0x36b   : > { %v1208_v44 = vadd.f32 %v1162_v48, %v3253_v15  ;;  %v1164_v9 = vadd.f32 %v1163_v3, %v3302_v23 }
 0x36c   : > { %v1165_v4 = vpop.f32.mrf.mxu0  ;;  %v1205_v18 = vpop.f32.mrf.mxu1 }
 0x36d   : > { %v2039_v19 = vmul.f32 -1.442695, %v1208_v44  ;;  %v1215_v35 = vadd.f32 %v1164_v9, %v3255_v17 }
 0x36e   : > { %v1166_v8 = vpop.f32.mrf.mxu0  ;;  %v2225_v5 = vpop.f32.mrf.mxu1 }
 0x36f   : > { %2509 = vpow2.f32 %v2039_v19  ;;  %v2040_v0 = vmul.f32 -1.442695, %v1215_v35 }
 0x371   : > { %2511 = vpow2.f32 %v2040_v0 }
 0x37c   : > { %v2510_v33 = vpop.eup %2509 }
 0x37d   : > { %v1212_v13 = vadd.f32 1.0, %v2510_v33 }
 0x37e   : > { %v2512_v10 = vpop.eup %2511 }
 0x37f   : > { %2513 = vrcp.f32 %v1212_v13  ;;  %v1219_v25 = vadd.f32 1.0, %v2512_v10 }
 0x38c   : > { %v2514_v63 = vpop.eup %2513 }
 0x38d   : > { %v1222_v15 = vmul.f32 %v2514_v63, %v1203_v11 }
 0x38f   : > { %v1223_v29 = vadd.f32 %v1222_v15, %v3258_v20 }
 0x391   : > { %2515 = vtanh.f32 %v1223_v29 }
 0x392   : > { %2517 = vrcp.f32 %v1219_v25 }
 0x39e   : > { %v2516_v42 = vpop.eup %2515 }
 0x39f   : > { %v1225_v12 = vsub.f32 %v3358_v1, %v2516_v42  ;;  %v2518_v2 = vpop.eup %2517 }
 0x3a1   : > { %v1226_v17 = vmul.f32 %v2518_v2, %v1225_v12 }
 0x3a3   : > { %v3405_v38 = vadd.f32 %v2516_v42, %v1226_v17 }
 0x3a5   : > { %1231 = vst [vmem:[#allocation10 + $0x10] sm:$0xff] %v3405_v38  ;;  %v1236_v48 = vpack.c.bf16 %v3405_v38, %v3405_v38 }
 0x3a7   : > { %1270 = vmatmul.mubr.bf16.vlgmr.msra.gmra.mxu0 %v1236_v48  ;;  %2243 = vmatmul.mubr.bf16.vlgmr.msra.gmra.mxu1 %v1236_v48 }
 0x3a8   : > { %1348 = vmatpush1.bf16.msra.mxu0 %v3092_v27  ;;  %2247 = vmatpush3.bf16.msra.mxu1 %v3118_v40 }
 0x3a9   : > { %1349 = vmatprep.subr.bf16.mxu0 %v3095_v28  ;;  %2248 = vmatprep.subr.bf16.mxu1 %v3721_v14 }
 0x3aa   : > { %1379 = vmatprep.mubr.bf16.mxu0 %v3722_v22  ;;  %2262 = vmatprep.mubr.msk.bf16.mxu1 %vm2827_vm0, %v3721_v14 }
 0x3ac   : > { %1350 = vmatpush1.bf16.msra.mxu0 %v3100_v30  ;;  %2249 = vmatpush3.bf16.msra.mxu1 %v3132_v45 }
 0x3ad   : > { %1351 = vmatprep.subr.bf16.mxu0 %v3107_v34  ;;  %2250 = vmatprep.subr.bf16.mxu1 %v3721_v14 }
 0x3b0   : > { %1352 = vmatpush1.bf16.msra.mxu0 %v3111_v36  ;;  %2251 = vmatpush3.bf16.msra.mxu1 %v3145_v50 }
 0x3b1   : > { %1353 = vmatprep.subr.bf16.mxu0 %v3115_v37  ;;  %2252 = vmatprep.subr.bf16.mxu1 %v3721_v14 }
 0x3b4   : > { %1354 = vmatpush1.bf16.msra.mxu0 %v3122_v41  ;;  %2253 = vmatpush3.bf16.msra.mxu1 %v3159_v54 }
 0x3b5   : > { %1355 = vmatprep.subr.bf16.mxu0 %v3127_v43  ;;  %2254 = vmatprep.subr.bf16.mxu1 %v3721_v14 }
 0x3b8   : > { %1356 = vmatpush1.bf16.msra.mxu0 %v3136_v46  ;;  %2255 = vmatpush3.bf16.msra.mxu1 %v3174_v57 }
 0x3b9   : > { %1357 = vmatprep.subr.bf16.mxu0 %v3141_v47  ;;  %2256 = vmatprep.subr.bf16.mxu1 %v3721_v14 }
 0x3bc   : > { %1358 = vmatpush1.bf16.msra.mxu0 %v3149_v51  ;;  %2257 = vmatpush3.bf16.msra.mxu1 %v3185_v59 }
 0x3bd   : > { %1359 = vmatprep.subr.bf16.mxu0 %v3154_v53  ;;  %2258 = vmatprep.subr.bf16.mxu1 %v3721_v14 }
 0x3c0   : > { %1360 = vmatpush1.bf16.msra.mxu0 %v3165_v55  ;;  %2259 = vmatpush3.bf16.msra.mxu1 %v3193_v60 }
 0x3c1   : > { %1361 = vmatprep.subr.bf16.mxu0 %v3170_v56  ;;  %2260 = vmatprep.subr.bf16.mxu1 %v3721_v14 }
 0x3c4   : > { %1362 = vmatpush1.bf16.msra.mxu0 %v3178_v58  ;;  %2261 = vmatpush3.bf16.msra.mxu1 %v3201_v61 }
 0x3c5   : > { %1457 = vmatprep.subr.bf16.mxu0 %v3089_v26  ;;  %2266 = vmatprep.subr.bf16.mxu1 %v3721_v14 }
 0x467   : > { %v1271_v20 = vpop.f32.mrf.mxu0  ;;  %v1312_v1 = vpop.f32.mrf.mxu1 }
 0x468   : > { %v1272_v16 = vadd.f32 %v1271_v20, %v3297_v62  ;;  %v1313_v11 = vadd.f32 %v1312_v1, %v3307_v49 }
 0x469   : > { %v1273_v3 = vpop.f32.mrf.mxu0  ;;  %v2244_v6 = vpop.f32.mrf.mxu1 }
 0x46a   : > { %v1318_v44 = vadd.f32 %v1272_v16, %v3260_v21  ;;  %v1274_v9 = vadd.f32 %v1273_v3, %v3302_v23 }
 0x46b   : > { %v1275_v4 = vpop.f32.mrf.mxu0  ;;  %v1315_v18 = vpop.f32.mrf.mxu1 }
 0x46c   : > { %v2041_v19 = vmul.f32 -1.442695, %v1318_v44  ;;  %v1325_v35 = vadd.f32 %v1274_v9, %v3262_v24 }
 0x46d   : > { %v1276_v8 = vpop.f32.mrf.mxu0  ;;  %v2245_v5 = vpop.f32.mrf.mxu1 }
 0x46e   : > { %2519 = vpow2.f32 %v2041_v19  ;;  %v2042_v0 = vmul.f32 -1.442695, %v1325_v35 }
 0x470   : > { %2521 = vpow2.f32 %v2042_v0 }
 0x47b   : > { %v2520_v33 = vpop.eup %2519 }
 0x47c   : > { %v1322_v13 = vadd.f32 1.0, %v2520_v33 }
 0x47d   : > { %v2522_v10 = vpop.eup %2521 }
 0x47e   : > { %2523 = vrcp.f32 %v1322_v13  ;;  %v1329_v29 = vadd.f32 1.0, %v2522_v10 }
 0x48b   : > { %v2524_v63 = vpop.eup %2523 }
 0x48c   : > { %v1332_v21 = vmul.f32 %v2524_v63, %v1313_v11 }
 0x48e   : > { %v1333_v15 = vadd.f32 %v1332_v21, %v3265_v31  ;;  %v3510_v21 = vld [vmem:[%s3013_s19 + $0x94] ss:$12 sps:$4 sm:$0xff]  }
 0x490   : > { %2525 = vtanh.f32 %v1333_v15  ;;  %v3518_v15 = vld [vmem:[%s3013_s19 + $0x90] ss:$12 sps:$4 sm:$0xff]  }
 0x491   : > { %2527 = vrcp.f32 %v1329_v29 }
 0x49d   : > { %v2526_v25 = vpop.eup %2525 }
 0x49e   : > { %v1335_v42 = vsub.f32 %v3405_v38, %v2526_v25  ;;  %v2528_v12 = vpop.eup %2527 }
 0x4a0   : > { %v1336_v24 = vmul.f32 %v2528_v12, %v1335_v42 }
 0x4a2   : > { %v3452_v2 = vadd.f32 %v2526_v25, %v1336_v24  ;;  %v3724_v25 = vld [vmem:[#allocation32_spill] sm:$0xff] }
 0x4a4   : > { %1341 = vst [vmem:[#allocation10 + $0x18] sm:$0xff] %v3452_v2  ;;  %v1346_v17 = vpack.c.bf16 %v3452_v2, %v3452_v2 }
 0x4a6   : > { %1380 = vmatmul.mubr.bf16.vlgmr.msra.gmra.mxu0 %v1346_v17  ;;  %2263 = vmatmul.mubr.bf16.vlgmr.msra.gmra.mxu1 %v1346_v17 }
 0x4a7   : > { %1458 = vmatpush1.bf16.msra.mxu0 %v3092_v27  ;;  %2267 = vmatpush3.bf16.msra.mxu1 %v3118_v40 }
 0x4a8   : > { %1459 = vmatprep.subr.bf16.mxu0 %v3095_v28  ;;  %2268 = vmatprep.subr.bf16.mxu1 %v3721_v14 }
 0x4a9   : > { %1489 = vmatprep.mubr.bf16.mxu0 %v3722_v22  ;;  %2282 = vmatprep.mubr.msk.bf16.mxu1 %vm2827_vm0, %v3721_v14 }
 0x4ab   : > { %1460 = vmatpush1.bf16.msra.mxu0 %v3100_v30  ;;  %2269 = vmatpush3.bf16.msra.mxu1 %v3132_v45 }
 0x4ac   : > { %1461 = vmatprep.subr.bf16.mxu0 %v3107_v34  ;;  %2270 = vmatprep.subr.bf16.mxu1 %v3721_v14 }
 0x4af   : > { %1462 = vmatpush1.bf16.msra.mxu0 %v3111_v36  ;;  %2271 = vmatpush3.bf16.msra.mxu1 %v3145_v50 }
 0x4b0   : > { %1463 = vmatprep.subr.bf16.mxu0 %v3115_v37  ;;  %2272 = vmatprep.subr.bf16.mxu1 %v3721_v14 }
 0x4b3   : > { %1464 = vmatpush1.bf16.msra.mxu0 %v3122_v41  ;;  %2273 = vmatpush3.bf16.msra.mxu1 %v3159_v54 }
 0x4b4   : > { %1465 = vmatprep.subr.bf16.mxu0 %v3127_v43  ;;  %2274 = vmatprep.subr.bf16.mxu1 %v3721_v14 }
 0x4b7   : > { %1466 = vmatpush1.bf16.msra.mxu0 %v3136_v46  ;;  %2275 = vmatpush3.bf16.msra.mxu1 %v3174_v57 }
 0x4b8   : > { %1467 = vmatprep.subr.bf16.mxu0 %v3141_v47  ;;  %2276 = vmatprep.subr.bf16.mxu1 %v3721_v14 }
 0x4bb   : > { %1468 = vmatpush1.bf16.msra.mxu0 %v3149_v51  ;;  %2277 = vmatpush3.bf16.msra.mxu1 %v3185_v59 }
 0x4bc   : > { %1469 = vmatprep.subr.bf16.mxu0 %v3154_v53  ;;  %2278 = vmatprep.subr.bf16.mxu1 %v3721_v14 }
 0x4bf   : > { %1470 = vmatpush1.bf16.msra.mxu0 %v3165_v55  ;;  %2279 = vmatpush3.bf16.msra.mxu1 %v3193_v60 }
 0x4c0   : > { %1471 = vmatprep.subr.bf16.mxu0 %v3170_v56  ;;  %2280 = vmatprep.subr.bf16.mxu1 %v3721_v14 }
 0x4c3   : > { %1472 = vmatpush1.bf16.msra.mxu0 %v3178_v58  ;;  %2281 = vmatpush3.bf16.msra.mxu1 %v3201_v61 }
 0x4c4   : > { %1567 = vmatprep.subr.bf16.mxu0 %v3089_v26  ;;  %2286 = vmatprep.subr.bf16.mxu1 %v3721_v14 }
 0x566   : > { %v1381_v27 = vpop.f32.mrf.mxu0  ;;  %v1422_v28 = vpop.f32.mrf.mxu1 }
 0x567   : > { %v1382_v30 = vadd.f32 %v1381_v27, %v3297_v62  ;;  %v1423_v5 = vadd.f32 %v1422_v28, %v3307_v49 }
 0x568   : > { %v1383_v31 = vpop.f32.mrf.mxu0  ;;  %v2264_v38 = vpop.f32.mrf.mxu1 }
 0x569   : > { %v1428_v48 = vadd.f32 %v1382_v30, %v3267_v32  ;;  %v1384_v44 = vadd.f32 %v1383_v31, %v3302_v23  ;;  %v2573_v31 = vld [vmem:[%s3013_s19 + $0xb0] ss:$12 sps:$4 sm:$0xff]   ;;  %v2574_v38 = vld [vmem:[%s3013_s19 + $0x98] ss:$12 sps:$4 sm:$0xff]  }
 0x56a   : > { %v1385_v20 = vpop.f32.mrf.mxu0  ;;  %v1425_v1 = vpop.f32.mrf.mxu1 }
 0x56b   : > { %v2043_v16 = vmul.f32 -1.442695, %v1428_v48  ;;  %v1435_v26 = vadd.f32 %v1384_v44, %v3272_v39  ;;  %v2575_v48 = vld [vmem:[%s3013_s19 + $0x7c] ss:$12 sps:$4 sm:$0xff]   ;;  %v2576_v20 = vld [vmem:[%s3013_s19 + $0x78] ss:$12 sps:$4 sm:$0xff]  }
 0x56c   : > { %v1386_v3 = vpop.f32.mrf.mxu0  ;;  %v2265_v6 = vpop.f32.mrf.mxu1  ;;  %v2577_v1 = vld [vmem:[%s3013_s19 + $0x80] ss:$12 sps:$4 sm:$0xff]   ;;  %v2582_v44 = vld [vmem:[%s3013_s19 + $0x48] ss:$12 sps:$4 sm:$0xff]  }
 0x56d   : > { %2529 = vpow2.f32 %v2043_v16  ;;  %v2044_v4 = vmul.f32 -1.442695, %v1435_v26  ;;  %v2579_v16 = vld [vmem:[%s3013_s19 + $0x60] ss:$12 sps:$4 sm:$0xff]   ;;  %v2580_v3 = vld [vmem:[%s3013_s19 + $0x68] ss:$12 sps:$4 sm:$0xff]  }
 0x56e   : > { %v2581_v6 = vld [vmem:[%s3013_s19 + $0x4c] ss:$12 sps:$4 sm:$0xff]   ;;  %v2583_v26 = vld [vmem:[%s3013_s19 + $0x50] ss:$12 sps:$4 sm:$0xff]  }
 0x56f   : > { %2531 = vpow2.f32 %v2044_v4  ;;  %v2584_v4 = vld [vmem:[%s3013_s19 + $0x34] ss:$12 sps:$4 sm:$0xff]  }
 0x57a   : > { %v2530_v18 = vpop.eup %2529 }
 0x57b   : > { %v1432_v19 = vadd.f32 1.0, %v2530_v18  ;;  %v2585_v18 = vld [vmem:[%s3013_s19 + $0x30] ss:$12 sps:$4 sm:$0xff]  }
 0x57c   : > { %v2532_v8 = vpop.eup %2531 }
 0x57d   : > { %2533 = vrcp.f32 %v1432_v19  ;;  %v1439_v0 = vadd.f32 1.0, %v2532_v8  ;;  %v2586_v19 = vld [vmem:[%s3013_s19 + $0x38] ss:$12 sps:$4 sm:$0xff]   ;;  %v2587_v8 = vld [vmem:[%s3013_s19 + $0x1c] ss:$12 sps:$4 sm:$0xff]  }
 0x58a   : > { %v2534_v32 = vpop.eup %2533 }
 0x58b   : > { %v1442_v9 = vmul.f32 %v2534_v32, %v1423_v5  ;;  %v2588_v5 = vld [vmem:[%s3013_s19 + $0x18] ss:$12 sps:$4 sm:$0xff]   ;;  %v2589_v32 = vld [vmem:[%s3013_s19 + $0x20] ss:$12 sps:$4 sm:$0xff]  }
 0x58d   : > { %v1443_v35 = vadd.f32 %v1442_v9, %v3280_v7  ;;  %v3505_v7 = vld [vmem:[%s3013_s19 + $0xa8] ss:$12 sps:$4 sm:$0xff]   ;;  %v2590_v9 = vld [vmem:[%s3013_s19 + $0x4] ss:$12 sps:$4 sm:$0xff]  }
 0x58f   : > { %2535 = vtanh.f32 %v1443_v35  ;;  %v2591_v35 = vld [vmem:[%s3013_s19] ss:$12 sps:$4 sm:$0xff]  }
 0x590   : > { %2537 = vrcp.f32 %v1439_v0  ;;  %v2592_v0 = vld [vmem:[%s3013_s19 + $0x8] ss:$12 sps:$4 sm:$0xff]  }
 0x59c   : > { %v2536_v33 = vpop.eup %2535 }
 0x59d   : > { %v1445_v39 = vsub.f32 %v3452_v2, %v2536_v33  ;;  %v2538_v13 = vpop.eup %2537 }
 0x59f   : > { %v1446_v10 = vmul.f32 %v2538_v13, %v1445_v39 }
 0x5a1   : > { %v3499_v11 = vadd.f32 %v2536_v33, %v1446_v10 }
 0x5a3   : > { %1451 = vst [vmem:[#allocation10 + $0x20] sm:$0xff] %v3499_v11  ;;  %v1456_v63 = vpack.c.bf16 %v3499_v11, %v3499_v11 }
 0x5a5   : > { %1490 = vmatmul.mubr.bf16.vlgmr.msra.gmra.mxu0 %v1456_v63  ;;  %2283 = vmatmul.mubr.bf16.vlgmr.msra.gmra.mxu1 %v1456_v63  ;;  %v3725_v63 = vld [vmem:[#allocation31_spill] sm:$0xff] }
 0x5a6   : > { %1568 = vmatpush1.bf16.msra.mxu0 %v3505_v7  ;;  %2287 = vmatpush3.bf16.msra.mxu1 %v3118_v40 }
 0x5a7   : > { %1569 = vmatprep.subr.bf16.mxu0 %v3510_v21  ;;  %2288 = vmatprep.subr.bf16.mxu1 %v3721_v14 }
 0x5a8   : > { %1599 = vmatprep.mubr.bf16.mxu0 %v3722_v22  ;;  %2302 = vmatprep.mubr.msk.bf16.mxu1 %vm2827_vm0, %v3721_v14 }
 0x5aa   : > { %1570 = vmatpush1.bf16.msra.mxu0 %v3518_v15  ;;  %2289 = vmatpush3.bf16.msra.mxu1 %v3132_v45 }
 0x5ab   : > { %1571 = vmatprep.subr.bf16.mxu0 %v3107_v34  ;;  %2290 = vmatprep.subr.bf16.mxu1 %v3721_v14  ;;  %v2572_v34 = vld [vmem:[%s3013_s19 + $0xac] ss:$12 sps:$4 sm:$0xff]  }
 0x5ae   : > { %1572 = vmatpush1.bf16.msra.mxu0 %v3111_v36  ;;  %2291 = vmatpush3.bf16.msra.mxu1 %v3145_v50 }
 0x5af   : > { %1573 = vmatprep.subr.bf16.mxu0 %v3115_v37  ;;  %2292 = vmatprep.subr.bf16.mxu1 %v3721_v14 }
 0x5b2   : > { %1574 = vmatpush1.bf16.msra.mxu0 %v3122_v41  ;;  %2293 = vmatpush3.bf16.msra.mxu1 %v3159_v54 }
 0x5b3   : > { %1575 = vmatprep.subr.bf16.mxu0 %v3127_v43  ;;  %2294 = vmatprep.subr.bf16.mxu1 %v3721_v14 }
 0x5b6   : > { %1576 = vmatpush1.bf16.msra.mxu0 %v3136_v46  ;;  %2295 = vmatpush3.bf16.msra.mxu1 %v3174_v57 }
 0x5b7   : > { %1577 = vmatprep.subr.bf16.mxu0 %v3141_v47  ;;  %2296 = vmatprep.subr.bf16.mxu1 %v3721_v14 }
 0x5ba   : > { %1578 = vmatpush1.bf16.msra.mxu0 %v3149_v51  ;;  %2297 = vmatpush3.bf16.msra.mxu1 %v3185_v59 }
 0x5bb   : > { %1579 = vmatprep.subr.bf16.mxu0 %v3154_v53  ;;  %2298 = vmatprep.subr.bf16.mxu1 %v3721_v14 }
 0x5be   : > { %1580 = vmatpush1.bf16.msra.mxu0 %v3165_v55  ;;  %2299 = vmatpush3.bf16.msra.mxu1 %v3193_v60  ;;  %v3723_v55 = vld [vmem:[#allocation29_spill] sm:$0xff] }
 0x5bf   : > { %1581 = vmatprep.subr.bf16.mxu0 %v3170_v56  ;;  %2300 = vmatprep.subr.bf16.mxu1 %v3721_v14 }
 0x5c2   : > { %1582 = vmatpush1.bf16.msra.mxu0 %v3178_v58  ;;  %2301 = vmatpush3.bf16.msra.mxu1 %v3201_v61 }
 0x5c3   : > { %1677 = vmatprep.subr.bf16.mxu0 %v2572_v34  ;;  %2306 = vmatprep.subr.bf16.mxu1 %v3721_v14 }
 0x665   : > { %v1491_v36 = vpop.f32.mrf.mxu0  ;;  %v1532_v37 = vpop.f32.mrf.mxu1 }
 0x666   : > { %v1492_v40 = vadd.f32 %v1491_v36, %v3297_v62  ;;  %v1533_v61 = vadd.f32 %v1532_v37, %v3307_v49 }
 0x667   : > { %v1493_v41 = vpop.f32.mrf.mxu0  ;;  %v2284_v43 = vpop.f32.mrf.mxu1 }
 0x668   : > { %v1538_v45 = vadd.f32 %v1492_v40, %v3277_v52  ;;  %v1494_v54 = vadd.f32 %v1493_v41, %v3302_v23  ;;  %v3726_v40 = vld [vmem:[#allocation33_spill] sm:$0xff] }
 0x669   : > { %v1495_v46 = vpop.f32.mrf.mxu0  ;;  %v1535_v47 = vpop.f32.mrf.mxu1 }
 0x66a   : > { %v2045_v50 = vmul.f32 -1.442695, %v1538_v45  ;;  %v1545_v56 = vadd.f32 %v1494_v54, %v3723_v55  ;;  %v3727_v54 = vld [vmem:[#allocation28_spill] sm:$0xff] }
 0x66b   : > { %v1496_v51 = vpop.f32.mrf.mxu0  ;;  %v2285_v53 = vpop.f32.mrf.mxu1 }
 0x66c   : > { %2539 = vpow2.f32 %v2045_v50  ;;  %v2046_v57 = vmul.f32 -1.442695, %v1545_v56 }
 0x66e   : > { %2541 = vpow2.f32 %v2046_v57 }
 0x679   : > { %v2540_v58 = vpop.eup %2539 }
 0x67a   : > { %v1542_v59 = vadd.f32 1.0, %v2540_v58 }
 0x67b   : > { %v2542_v60 = vpop.eup %2541 }
 0x67c   : > { %2543 = vrcp.f32 %v1542_v59  ;;  %v1549_v12 = vadd.f32 1.0, %v2542_v60 }
 0x689   : > { %v2544_v29 = vpop.eup %2543 }
 0x68a   : > { %v1552_v52 = vmul.f32 %v2544_v29, %v1533_v61 }
 0x68c   : > { %v1553_v42 = vadd.f32 %v1552_v52, %v3724_v25 }
 0x68e   : > { %2545 = vtanh.f32 %v1553_v42 }
 0x68f   : > { %2547 = vrcp.f32 %v1549_v12 }
 0x69b   : > { %v2546_v24 = vpop.eup %2545 }
 0x69c   : > { %v1555_v2 = vsub.f32 %v3499_v11, %v2546_v24  ;;  %v2548_v17 = vpop.eup %2547 }
 0x69e   : > { %v1556_v27 = vmul.f32 %v2548_v17, %v1555_v2  ;;  %v3728_v2 = vld [vmem:[#allocation34_spill] sm:$0xff] }
 0x6a0   : > { %v3555_v28 = vadd.f32 %v2546_v24, %v1556_v27 }
 0x6a2   : > { %1561 = vst [vmem:[#allocation10 + $0x28] sm:$0xff] %v3555_v28  ;;  %v1566_v30 = vpack.c.bf16 %v3555_v28, %v3555_v28 }
 0x6a4   : > { %1600 = vmatmul.mubr.bf16.vlgmr.msra.gmra.mxu0 %v1566_v30  ;;  %2303 = vmatmul.mubr.bf16.vlgmr.msra.gmra.mxu1 %v1566_v30 }
 0x6a5   : > { %1678 = vmatpush1.bf16.msra.mxu0 %v3505_v7  ;;  %2307 = vmatpush3.bf16.msra.mxu1 %v2573_v31 }
 0x6a6   : > { %1679 = vmatprep.subr.bf16.mxu0 %v3510_v21  ;;  %2308 = vmatprep.subr.bf16.mxu1 %v3721_v14 }
 0x6a7   : > { %1709 = vmatprep.mubr.bf16.mxu0 %v3722_v22  ;;  %2322 = vmatprep.mubr.msk.bf16.mxu1 %vm2827_vm0, %v3721_v14  ;;  %v2578_v22 = vld [vmem:[%s3013_s19 + $0x64] ss:$12 sps:$4 sm:$0xff]   ;;  %s3611_s19 = scalar_lea.hbm %s3683_s6, %s2053_s23 }
 0x6a9   : > { %1680 = vmatpush1.bf16.msra.mxu0 %v3518_v15  ;;  %2309 = vmatpush3.bf16.msra.mxu1 %v2574_v38 }
 0x6aa   : > { %1681 = vmatprep.subr.bf16.mxu0 %v2575_v48  ;;  %2310 = vmatprep.subr.bf16.mxu1 %v3721_v14 }
 0x6ad   : > { %1682 = vmatpush1.bf16.msra.mxu0 %v2576_v20  ;;  %2311 = vmatpush3.bf16.msra.mxu1 %v2577_v1  ;;  %v3729_v20 = vld [vmem:[#allocation35_spill] sm:$0xff] }
 0x6ae   : > { %1683 = vmatprep.subr.bf16.mxu0 %v2578_v22  ;;  %2312 = vmatprep.subr.bf16.mxu1 %v3721_v14 }
 0x6b1   : > { %1684 = vmatpush1.bf16.msra.mxu0 %v2579_v16  ;;  %2313 = vmatpush3.bf16.msra.mxu1 %v2580_v3 }
 0x6b2   : > { %1685 = vmatprep.subr.bf16.mxu0 %v2581_v6  ;;  %2314 = vmatprep.subr.bf16.mxu1 %v3721_v14 }
 0x6b5   : > { %1686 = vmatpush1.bf16.msra.mxu0 %v2582_v44  ;;  %2315 = vmatpush3.bf16.msra.mxu1 %v2583_v26 }
 0x6b6   : > { %1687 = vmatprep.subr.bf16.mxu0 %v2584_v4  ;;  %2316 = vmatprep.subr.bf16.mxu1 %v3721_v14  ;;  %v3730_v4 = vld [vmem:[#allocation30_spill] sm:$0xff] }
 0x6b9   : > { %1688 = vmatpush1.bf16.msra.mxu0 %v2585_v18  ;;  %2317 = vmatpush3.bf16.msra.mxu1 %v2586_v19 }
 0x6ba   : > { %1689 = vmatprep.subr.bf16.mxu0 %v2587_v8  ;;  %2318 = vmatprep.subr.bf16.mxu1 %v3721_v14 }
 0x6bd   : > { %1690 = vmatpush1.bf16.msra.mxu0 %v2588_v5  ;;  %2319 = vmatpush3.bf16.msra.mxu1 %v2589_v32 }
 0x6be   : > { %1691 = vmatprep.subr.bf16.mxu0 %v2590_v9  ;;  %2320 = vmatprep.subr.bf16.mxu1 %v3721_v14 }
 0x6c1   : > { %1692 = vmatpush1.bf16.msra.mxu0 %v2591_v35  ;;  %2321 = vmatpush3.bf16.msra.mxu1 %v2592_v0 }
 0x764   : > { %v1601_v33 = vpop.f32.mrf.mxu0  ;;  %v1642_v39 = vpop.f32.mrf.mxu1 }
 0x765   : > { %v1602_v13 = vadd.f32 %v1601_v33, %v3297_v62  ;;  %v1643_v50 = vadd.f32 %v1642_v39, %v3307_v49 }
 0x766   : > { %v1603_v10 = vpop.f32.mrf.mxu0  ;;  %v2304_v11 = vpop.f32.mrf.mxu1 }
 0x767   : > { %v1648_v7 = vadd.f32 %v1602_v13, %v3725_v63  ;;  %v1604_v14 = vadd.f32 %v1603_v10, %v3302_v23 }
 0x768   : > { %v1605_v21 = vpop.f32.mrf.mxu0  ;;  %v1645_v15 = vpop.f32.mrf.mxu1 }
 0x769   : > { %v2047_v34 = vmul.f32 -1.442695, %v1648_v7  ;;  %v1655_v41 = vadd.f32 %v1604_v14, %v3726_v40 }
 0x76a   : > { %v1606_v36 = vpop.f32.mrf.mxu0  ;;  %v2305_v37 = vpop.f32.mrf.mxu1 }
 0x76b   : > { %2549 = vpow2.f32 %v2047_v34  ;;  %v2048_v43 = vmul.f32 -1.442695, %v1655_v41 }
 0x76d   : > { %2551 = vpow2.f32 %v2048_v43 }
 0x778   : > { %v2550_v45 = vpop.eup %2549 }
 0x779   : > { %v1652_v46 = vadd.f32 1.0, %v2550_v45 }
 0x77a   : > { %v2552_v47 = vpop.eup %2551 }
 0x77b   : > { %2553 = vrcp.f32 %v1652_v46  ;;  %v1659_v56 = vadd.f32 1.0, %v2552_v47 }
 0x788   : > { %v2554_v51 = vpop.eup %2553 }
 0x789   : > { %v1662_v53 = vmul.f32 %v2554_v51, %v1643_v50 }
 0x78b   : > { %v1663_v55 = vadd.f32 %v1662_v53, %v3727_v54 }
 0x78d   : > { %2555 = vtanh.f32 %v1663_v55 }
 0x78e   : > { %2557 = vrcp.f32 %v1659_v56 }
 0x79a   : > { %v2556_v57 = vpop.eup %2555 }
 0x79b   : > { %v1665_v58 = vsub.f32 %v3555_v28, %v2556_v57  ;;  %v2558_v59 = vpop.eup %2557 }
 0x79d   : > { %v1666_v60 = vmul.f32 %v2558_v59, %v1665_v58 }
 0x79f   : > { %v1667_v61 = vadd.f32 %v2556_v57, %v1666_v60 }
 0x7a1   : > { %1671 = vst [vmem:[#allocation10 + $0x30] sm:$0xff] %v1667_v61  ;;  %v1676_v29 = vpack.c.bf16 %v1667_v61, %v1667_v61 }
 0x7a3   : > { %1710 = vmatmul.mubr.bf16.vlgmr.msra.gmra.mxu0 %v1676_v29  ;;  %2323 = vmatmul.mubr.bf16.vlgmr.msra.gmra.mxu1 %v1676_v29 }
 0x863   : > { %v1711_v52 = vpop.f32.mrf.mxu0  ;;  %v1752_v25 = vpop.f32.mrf.mxu1 }
 0x864   : > { %v1712_v42 = vadd.f32 %v1711_v52, %v3297_v62  ;;  %v1753_v6 = vadd.f32 %v1752_v25, %v3307_v49 }
 0x865   : > { %v1713_v12 = vpop.f32.mrf.mxu0  ;;  %v2324_v24 = vpop.f32.mrf.mxu1 }
 0x866   : > { %v1758_v17 = vadd.f32 %v1712_v42, %v3728_v2  ;;  %v1714_v48 = vadd.f32 %v1713_v12, %v3302_v23 }
 0x867   : > { %v1715_v27 = vpop.f32.mrf.mxu0  ;;  %v1755_v30 = vpop.f32.mrf.mxu1 }
 0x868   : > { %v2049_v31 = vmul.f32 -1.442695, %v1758_v17  ;;  %v1765_v1 = vadd.f32 %v1714_v48, %v3729_v20 }
 0x869   : > { %v1716_v38 = vpop.f32.mrf.mxu0  ;;  %v2325_v28 = vpop.f32.mrf.mxu1 }
 0x86a   : > { %2559 = vpow2.f32 %v2049_v31  ;;  %v2050_v22 = vmul.f32 -1.442695, %v1765_v1 }
 0x86c   : > { %2561 = vpow2.f32 %v2050_v22 }
 0x877   : > { %v2560_v16 = vpop.eup %2559 }
 0x878   : > { %v1762_v3 = vadd.f32 1.0, %v2560_v16 }
 0x879   : > { %v2562_v62 = vpop.eup %2561 }
 0x87a   : > { %2563 = vrcp.f32 %v1762_v3  ;;  %v1769_v18 = vadd.f32 1.0, %v2562_v62 }
 0x887   : > { %v2564_v44 = vpop.eup %2563 }
 0x888   : > { %v1772_v26 = vmul.f32 %v2564_v44, %v1753_v6 }
 0x88a   : > { %v1773_v23 = vadd.f32 %v1772_v26, %v3730_v4 }
 0x88c   : > { %2565 = vtanh.f32 %v1773_v23 }
 0x88d   : > { %2567 = vrcp.f32 %v1769_v18 }
 0x899   : > { %v2566_v19 = vpop.eup %2565 }
 0x89a   : > { %v1775_v8 = vsub.f32 %v1667_v61, %v2566_v19  ;;  %v2568_v5 = vpop.eup %2567 }
 0x89c   : > { %v1776_v32 = vmul.f32 %v2568_v5, %v1775_v8 }
 0x89e   : > { %v1777_v9 = vadd.f32 %v2566_v19, %v1776_v32 }
 0x8a0   : > { %1781 = vst [vmem:[#allocation10 + $0x38] sm:$0xff] %v1777_v9  ;;  %1782 = vst [vmem:[%s3059_s21] sm:$0xff] %v1777_v9 }
 0x8a1   : > { %2714 = shalt.err (!%p2711_p0)
}
 0x8a2   : > { %s2828_s17 = smov 128   ;;  %s2829_s24 = smov 8  }
 0x8a3   : > { %p3732_p3 = pmov %p3731_p2  ;;  %s3733_s30 = sld [smem:[#allocation37_spill]] }
 0x8a4   : > { %s1784_s13 = scalar_lea.sflag [#allocation12], %s3002_s2  ;;  %s2725_s15 = scalar_lea.vmem %s3613_s12, 128 }
 0x8a5   : > { %p2726_p8 = scmp.ne.s32.totalorder %s3613_s12, %s2725_s15  ;;  %s2830_s11 = smov [#allocation11]  }
 0x8a6   : > { %s2729_s9 = sshll.u32 %s2830_s11, 4  ;;  %s2730_s9 = int_to_ptr.vmem [resolvable:$false] %s2729_s9 }
 0x8a7   : > { %p2727_p4 = pnand %p2726_p8, %p2923_p9  ;;  %s2731_s28 = scalar_lea.vmem %s2730_s9, 256 }
 0x8a8   : > { %p2732_p13 = scmp.lt.s32.totalorder %s3613_s12, %s2730_s9  ;;  %p2733_p6 = scmp.lt.s32.totalorder %s2731_s28, %s2725_s15 }
 0x8a9   : > { %2345 = dma.vmem_to_hbm [thread:$0]  (%p3732_p3), %s3024_s14, 1024, %s3733_s30, [#allocation6], %s2828_s17, %s2828_s17, %s2829_s24  }
 0x8aa   : > { %p2728_p10 = pneg %p2727_p4  ;;  %p2734_p12 = por %p2733_p6, %p2732_p13 }
 0x8ac   : > { %p2735_p1 = pnand %p2734_p12, %p2728_p10 }
 0x8ae   : > { %2738 = shalt.err (!%p2735_p1)
}
 0x8af   : > { %s2739_s14 = scalar_lea.hbm %s3611_s19, 128  ;;  %s2743_s5 = scalar_lea.hbm %s3683_s6, 256 }
 0x8b0   : > { %p2740_p2 = scmp.ne.s32.totalorder %s3611_s19, %s2739_s14  ;;  %p2744_p0 = scmp.lt.s32.totalorder %s3611_s19, %s3683_s6 }
 0x8b1   : > { %p2745_p3 = scmp.lt.s32.totalorder %s2743_s5, %s2739_s14 }
 0x8b2   : > { %p2741_p5 = pnand %p2740_p2, %p2923_p9 }
 0x8b3   : > { %p2746_p8 = por %p2745_p3, %p2744_p0 }
 0x8b4   : > { %p2742_p7 = pneg %p2741_p5 }
 0x8b6   : > { %p2747_p4 = pnand %p2746_p8, %p2742_p7 }
 0x8b8   : > { %2750 = shalt.err (!%p2747_p4)
}
 0x8b9   : > { %2346 = dma.vmem_to_hbm [thread:$0]  (%p2923_p9), %s3613_s12, 128, %s3611_s19, %s1784_s13  }
 0x8ba   : > { %p3734_p10 = scmp.eq.s32.totalorder %s2897_s27, 1 }
 0x8bc   : > { %2788 = dma.done.wait (%p3734_p10), [#allocation6], 1024   ;;  %p3735_p13 = pmov %p3734_p10 }
 0x8be   : > { %2790 = vsyncadd (%p3735_p13), [#allocation6], 4294966272 }
 0x8bf PF: > { %s3736_s21 = sld [smem:[#allocation22_spill]] }
 0x8c0   : > { %s3738_s16 = sld [smem:[#allocation24_spill]] }
 0x8c5   : > { %s1829_s8 = sand.u32 1, %s3736_s21  }
 0x8c6   : > { %p3739_p6 = scmp.ge.s32.totalorder %s3738_s16, 2  ;;  %s1830_s17 = scalar_lea.sflag [#allocation12], %s1829_s8 }
 0x8c8   : > { %p2361_p12 = pnand %p3739_p6, %p2930_p11 }
 0x8ca   : > { %p2362_p1 = pneg %p2361_p12 }
 0x8cc   : > { %2792 = dma.done.wait (%p2362_p1), %s1830_s17, 128  }
 0x8cd   : > { %2794 = vsyncadd (%p2362_p1), %s1830_s17, 4294967168  ;;  %s27_s26 = sadd.s32 1, %s3738_s16   ;;  %s3740_s10 = sld [smem:[#allocation23_spill]] }
 0x8ce   : > { %p24_p9 = scmp.ge.s32.totalorder %s27_s26, 4   ;;  %s3741_s23 = sld [smem:[#allocation26_spill]] }
 0x8cf   : > { %s3742_s27 = sld [smem:[#allocation25_spill]]  ;;  %s3743_s21 = smov %s2801_s22 }
 0x8d0   : > { %s3745_s24 = smov %s2813_s25 }
 0x8d1   :  { %26 = sbr.rel (!%p24_p9) target bundleno = 12 (0xc), region = 142 }
 0x8d3   : > { %s3744_s22 = smov %s3740_s10 }
 0x8d5   : > { %s3746_s25 = smov %s3742_s27 }
 0x8d6   :  { %1835 = vsyncpa [#allocation5], 1 }
 0x8d7   :  { %1837 = vsyncpa [#allocation5 + $0x1], 1 }
 0x8d8   :  { %1838 = vsyncpa [#allocation8], 1 }
 0x8d9   :  { %1840 = vsyncpa [#allocation8 + $0x1], 1 }
 0x8da   :  { %1841 = vsyncpa [#allocation6], 1 }
 0x8db   :  { %1843 = vsyncpa [#allocation6 + $0x1], 1 }
 0x8dc   :  { %1844 = vsyncpa [#allocation12], 1 }
 0x8dd   :  { %1846 = vsyncpa [#allocation12 + $0x1], 1 }
 0x8de   :  { %1847 = vsyncmov [#allocation3] }
 0x8e1   :  { %s1848_s12 = vpop.sfrf %1847 }
 0x8e2   :  { %p2057_p11 = scmp.ne.s32.totalorder %s1848_s12, 0 }
 0x8e4   :  { %1852 = shalt.err (%p2057_p11)  }

</bundles_post_ra>
